<compile_context>
chip_gen: v6e
topology: v6e:2x2x1
jax: 0.10.0
libtpu: 0.0.40
codegen_flags: <defaults>
</compile_context>

<pallas_src>
import math
import functools

import jax
import jax.numpy as jnp
from jax.experimental import pallas as pl
from jax.experimental.pallas import tpu as pltpu


_VMEM_LIMIT = 48 * 1024 * 1024  # leaves headroom on v7x's 64 MiB physical VMEM


def _round_up(x, m):
    return ((x + m - 1) // m) * m


def _pick_tile(n_pad, candidates):
    for c in candidates:
        if n_pad % c == 0:
            return c
    return n_pad  # unreachable: n_pad is always a multiple of 128


def _pad2(a, rows, cols):
    return jnp.pad(a, ((0, rows - a.shape[0]), (0, cols - a.shape[1])))


# ---------------------------------------------------------------------------
# GraphConv layer kernel:  h_out = relu( [adj @ h , h] @ [W_rel; W_root] + b )
# Grid = (row tiles "parallel", adj-column tiles "arbitrary").
# ---------------------------------------------------------------------------
def _graphconv_kernel(adj_ref, hprev_ref, hself_ref, w_ref, b_ref, out_ref, acc_ref):
    k = pl.program_id(1)
    f_pad = hself_ref.shape[1]
    tm = acc_ref.shape[0]

    @pl.when(k == 0)
    def _init():
        # first half of the accumulator: aggregation; second half: root (self) term
        acc_ref[:, :f_pad] = jnp.zeros((tm, f_pad), jnp.float32)
        acc_ref[:, f_pad:] = hself_ref[...].astype(jnp.float32)

    # partial aggregation over this adj column tile (bf16 MXU, f32 accumulate)
    acc_ref[:, :f_pad] += jnp.dot(
        adj_ref[...], hprev_ref[...], preferred_element_type=jnp.float32)

    @pl.when(k == pl.num_programs(1) - 1)
    def _finalize():
        # single fused K = 2*F_pad matmul: [agg, h_self] @ [W_rel; W_root]
        z = jnp.dot(acc_ref[...].astype(jnp.bfloat16), w_ref[...],
                    preferred_element_type=jnp.float32) + b_ref[...]
        out_ref[...] = jnp.maximum(z, 0.0).astype(out_ref.dtype)


def _graphconv_layer(adj, h, w_stack, b, *, n_pad, tm, tk, f_pad, h_pad):
    grid = (n_pad // tm, n_pad // tk)
    flops = 2 * n_pad * n_pad * f_pad + 2 * n_pad * (2 * f_pad) * h_pad
    bytes_accessed = (n_pad * n_pad * 2            # adj (bf16)
                      + 2 * n_pad * f_pad * 2      # h read twice (bf16)
                      + 2 * f_pad * h_pad * 2      # stacked weight
                      + h_pad * 4                  # bias
                      + n_pad * h_pad * 2)         # output
    return pl.pallas_call(
        _graphconv_kernel,
        out_shape=jax.ShapeDtypeStruct((n_pad, h_pad), jnp.bfloat16),
        grid=grid,
        in_specs=[
            pl.BlockSpec((tm, tk), lambda i, k: (i, k)),          # adj tile
            pl.BlockSpec((tk, f_pad), lambda i, k: (k, 0)),       # h rows (neighbors)
            pl.BlockSpec((tm, f_pad), lambda i, k: (i, 0)),       # h rows (self / root)
            pl.BlockSpec((2 * f_pad, h_pad), lambda i, k: (0, 0)),  # [W_rel; W_root]
            pl.BlockSpec((1, h_pad), lambda i, k: (0, 0)),        # bias
        ],
        out_specs=pl.BlockSpec((tm, h_pad), lambda i, k: (i, 0)),
        scratch_shapes=[pltpu.VMEM((tm, 2 * f_pad), jnp.float32)],
        compiler_params=pltpu.CompilerParams(
            dimension_semantics=("parallel", "arbitrary"),
            vmem_limit_bytes=_VMEM_LIMIT),
        cost_estimate=pl.CostEstimate(
            flops=flops, transcendentals=0, bytes_accessed=bytes_accessed),
    )(adj, h, h, w_stack, b)


# ---------------------------------------------------------------------------
# JK head kernel: logits = sum_l h_l @ W_fin_l + b_fin ; softmax over classes.
# (Per-layer slab accumulation replaces the jumping-knowledge concat.)
# ---------------------------------------------------------------------------
def _make_jk_head_kernel(n_layers, n_classes):
    def kernel(*refs):
        out_ref = refs[-1]
        b_ref = refs[-2]
        h_refs = refs[:n_layers]
        w_refs = refs[n_layers:2 * n_layers]
        tm, c_pad = out_ref.shape

        acc = jnp.dot(h_refs[0][...], w_refs[0][...],
                      preferred_element_type=jnp.float32)
        for l in range(1, n_layers):
            acc = acc + jnp.dot(h_refs[l][...], w_refs[l][...],
                                preferred_element_type=jnp.float32)
        logits = acc + b_ref[...]

        # mask the padded class lanes before the softmax
        col = jax.lax.broadcasted_iota(jnp.int32, (tm, c_pad), 1)
        logits = jnp.where(col < n_classes, logits, jnp.full_like(logits, -1e30))

        m = jnp.max(logits, axis=-1, keepdims=True)
        e = jnp.exp(logits - m)
        denom = jnp.sum(e, axis=-1, keepdims=True)
        out_ref[...] = e * pl.reciprocal(denom, approx=True)

    return kernel


def _jk_head(h_list, wfin_slabs, b_fin, *, n_classes, n_pad, tm, h_pad, c_pad):
    n_layers = len(h_list)
    flops = 2 * n_pad * h_pad * c_pad * n_layers + 4 * n_pad * c_pad
    bytes_accessed = (n_layers * n_pad * h_pad * 2
                      + n_layers * h_pad * c_pad * 2
                      + c_pad * 4
                      + n_pad * c_pad * 4)
    h_spec = pl.BlockSpec((tm, h_pad), lambda i: (i, 0))
    w_spec = pl.BlockSpec((h_pad, c_pad), lambda i: (0, 0))
    b_spec = pl.BlockSpec((1, c_pad), lambda i: (0, 0))
    return pl.pallas_call(
        _make_jk_head_kernel(n_layers, n_classes),
        out_shape=jax.ShapeDtypeStruct((n_pad, c_pad), jnp.float32),
        grid=(n_pad // tm,),
        in_specs=[h_spec] * n_layers + [w_spec] * n_layers + [b_spec],
        out_specs=pl.BlockSpec((tm, c_pad), lambda i: (i, 0)),
        compiler_params=pltpu.CompilerParams(
            dimension_semantics=("parallel",),
            vmem_limit_bytes=_VMEM_LIMIT),
        cost_estimate=pl.CostEstimate(
            flops=flops, transcendentals=n_pad * c_pad + n_pad,
            bytes_accessed=bytes_accessed),
    )(*h_list, *wfin_slabs, b_fin)


# ---------------------------------------------------------------------------
# Forward wrapper (JAX glue: adjacency scatter-add, padding, weight packing).
# ---------------------------------------------------------------------------
def jknet_forward(x, edge_index, params, *, n_layers, n_classes, edge_weight=None):
    n_nodes, f_in0 = x.shape
    n_hidden = params[0].shape[1]

    n_pad = _round_up(n_nodes, 128)
    tm = _pick_tile(n_pad, (512, 256, 128))
    tk = _pick_tile(n_pad, (1024, 512, 256, 128))
    h_pad = _round_up(n_hidden, 128)
    c_pad = _round_up(n_classes, 128)

    # dense adjacency (scatter-add glue): adj[i, j] = weight of edge j -> i
    src = edge_index[0]
    dst = edge_index[1]
    if edge_weight is None:
        edge_weight = jnp.ones((edge_index.shape[1],), jnp.float32)
    adj = jnp.zeros((n_pad, n_pad), jnp.float32).at[dst, src].add(edge_weight)
    adj = adj.astype(jnp.bfloat16)

    # padded, bf16 node features
    h = _pad2(x.astype(jnp.float32), n_pad, _round_up(f_in0, 128)).astype(jnp.bfloat16)

    h_list = []
    for l in range(n_layers):
        w_rel, b_rel, w_root = params[3 * l], params[3 * l + 1], params[3 * l + 2]
        f_in = w_rel.shape[0]
        f_pad = _round_up(f_in, 128)
        # stacked [W_rel; W_root] so the layer does a single K = 2*F_pad matmul
        w_stack = jnp.zeros((2 * f_pad, h_pad), jnp.float32)
        w_stack = w_stack.at[:f_in, :n_hidden].set(w_rel)
        w_stack = w_stack.at[f_pad:f_pad + f_in, :n_hidden].set(w_root)
        w_stack = w_stack.astype(jnp.bfloat16)
        b_pad = _pad2(b_rel, 1, h_pad)  # f32

        h = _graphconv_layer(adj, h, w_stack, b_pad,
                             n_pad=n_pad, tm=tm, tk=tk, f_pad=f_pad, h_pad=h_pad)
        h_list.append(h)

    # final Linear split into per-layer slabs (replaces the JK concat)
    w_fin, b_fin = params[-2], params[-1]
    wfin_slabs = []
    for l in range(n_layers):
        slab = w_fin[l * n_hidden:(l + 1) * n_hidden, :]
        wfin_slabs.append(_pad2(slab, h_pad, c_pad).astype(jnp.bfloat16))
    b_fin_pad = _pad2(b_fin, 1, c_pad)  # f32

    probs = _jk_head(h_list, wfin_slabs, b_fin_pad, n_classes=n_classes,
                     n_pad=n_pad, tm=tm, h_pad=h_pad, c_pad=c_pad)
    return probs[:n_nodes, :n_classes]


# ---------------------------------------------------------------------------
# Pure-JAX f32 reference (matches the torch JKNet forward) + param init.
# ---------------------------------------------------------------------------
def jknet_reference(x, edge_index, params, *, n_layers, n_classes, edge_weight=None):
    n_nodes = x.shape[0]
    src, dst = edge_index[0], edge_index[1]
    if edge_weight is None:
        edge_weight = jnp.ones((edge_index.shape[1],), jnp.float32)
    adj = jnp.zeros((n_nodes, n_nodes), jnp.float32).at[dst, src].add(edge_weight)
    h = x
    acts = []
    for l in range(n_layers):
        w_rel, b_rel, w_root = params[3 * l], params[3 * l + 1], params[3 * l + 2]
        agg = adj @ h
        h = agg @ w_rel + b_rel + h @ w_root
        h = jnp.maximum(h, 0.0)
        acts.append(h)
    h_cat = jnp.concatenate(acts, axis=-1)
    logits = h_cat @ params[-2] + params[-1]
    return jax.nn.softmax(logits, axis=-1)


def init_params(key, in_feats, n_hidden, n_classes, n_layers):
    """Deterministic synthetic init mirroring torch Linear shapes (stored as (in, out))."""
    params = []
    dims_in = [in_feats] + [n_hidden] * (n_layers - 1)

    def uniform(k, shape, fan_in):
        bound = 1.0 / math.sqrt(fan_in)
        return jax.random.uniform(k, shape, jnp.float32, -bound, bound)

    for l in range(n_layers):
        key, k1, k2, k3 = jax.random.split(key, 4)
        f_in = dims_in[l]
        params.append(uniform(k1, (f_in, n_hidden), f_in))   # W_rel
        params.append(uniform(k2, (1, n_hidden), f_in))      # b_rel
        params.append(uniform(k3, (f_in, n_hidden), f_in))   # W_root (no bias in PyG)

    key, k1, k2 = jax.random.split(key, 3)
    f_in = n_layers * n_hidden
    params.append(uniform(k1, (f_in, n_classes), f_in))       # final Linear weight
    params.append(uniform(k2, (1, n_classes), f_in))          # final Linear bias
    return params


if __name__ == "__main__":
    # JKNet(in_feats=16, n_hidden=32, n_classes=8, n_layers=3)
    #   -> 3 GraphConv layers (16->32, 32->32, 32->32) + Linear(96 -> 8) + softmax
    N = 300          # nodes (pads to 384 -> 3x3 grid: exercises both grid axes)
    E = 1200         # edges
    in_feats = 16
    n_hidden = 32
    n_classes = 8
    n_layers = 3

    key = jax.random.PRNGKey(0)
    key, kx, ke = jax.random.split(key, 3)

    x = jax.random.normal(kx, (N, in_feats), jnp.float32)
    edge_index = jax.random.randint(ke, (2, E), 0, N, jnp.int32)
    params = init_params(key, in_feats, n_hidden, n_classes, n_layers)

    fwd = jax.jit(functools.partial(
        jknet_forward, n_layers=n_layers, n_classes=n_classes))
    out = jax.block_until_ready(fwd(x, edge_index, params))

    ref = jax.block_until_ready(jknet_reference(
        x, edge_index, params, n_layers=n_layers, n_classes=n_classes))

    assert out.shape == (N, n_classes)
    assert bool(jnp.all(jnp.isfinite(out)))
    # rows of softmax sum to 1 (approx reciprocal -> loose-ish tolerance)
    assert bool(jnp.allclose(jnp.sum(out, axis=1), 1.0, atol=5e-3))
    # bf16 kernel vs f32 reference
    assert float(jnp.max(jnp.abs(out - ref))) < 0.1

    print("KERNEL_OK")
</pallas_src>

<mosaic_0001>
module attributes {stable_mosaic.version = 11 : i64} {
  func.func private @main(%arg0: i32) attributes {dimension_semantics = [#tpu.dimension_semantics<core_parallel>], iteration_bounds = array<i64: 2>, tpu.core_type = #tpu.core_type<sc_scalar_subcore>, window_params = []} {
    return
  }
}

module attributes {stable_mosaic.version = 11 : i64} {
  func.func private @main(%arg0: i32) attributes {dimension_semantics = [#tpu.dimension_semantics<core_parallel>], iteration_bounds = array<i64: 2>, tpu.core_type = #tpu.core_type<sc_scalar_subcore>, window_params = []} {
    return
  }
}

module attributes {stable_mosaic.version = 11 : i64} {
  func.func @_graphconv_kernel(%arg0: i32, %arg1: i32, %arg2: memref<128x128xbf16, #tpu.memory_space<vmem>>, %arg3: memref<128x128xbf16, #tpu.memory_space<vmem>>, %arg4: memref<128x128xbf16, #tpu.memory_space<vmem>>, %arg5: memref<256x128xbf16, #tpu.memory_space<vmem>>, %arg6: memref<1x128xf32, #tpu.memory_space<vmem>>, %arg7: memref<128x128xbf16, #tpu.memory_space<vmem>>, %arg8: memref<128x256xf32, #tpu.memory_space<vmem>>) attributes {dimension_semantics = [#tpu.dimension_semantics<parallel>, #tpu.dimension_semantics<arbitrary>], iteration_bounds = array<i64: 3, 3>, scalar_prefetch = 0 : i64, scratch_operands = 1 : i64, tpu.core_type = #tpu.core_type<tc>, window_params = [{transform_indices = @transform_0, window_bounds = array<i64: 128, 128>}, {transform_indices = @transform_1, window_bounds = array<i64: 128, 128>}, {transform_indices = @transform_2, window_bounds = array<i64: 128, 128>}, {pipeline_mode = #tpu.pipeline_mode<synchronous>, transform_indices = @transform_3, window_bounds = array<i64: 256, 128>}, {pipeline_mode = #tpu.pipeline_mode<synchronous>, transform_indices = @transform_4, window_bounds = array<i64: 1, 128>}, {transform_indices = @transform_5, window_bounds = array<i64: 128, 128>}]} {
    %c0_i32 = arith.constant 0 : i32
    %0 = arith.cmpi eq, %arg1, %c0_i32 : i32
    %1 = arith.extui %0 : i1 to i32
    %c0_i32_0 = arith.constant 0 : i32
    %2 = arith.cmpi ne, %1, %c0_i32_0 : i32
    scf.if %2 {
      %cst_9 = arith.constant 0.000000e+00 : f32
      %12 = vector.broadcast %cst_9 : f32 to vector<128x128xf32>
      %c0_10 = arith.constant 0 : index
      %c0_11 = arith.constant 0 : index
      %13 = vector.load %arg8[%c0_10, %c0_11] : memref<128x256xf32, #tpu.memory_space<vmem>>, vector<128x128xf32>
      tpu.vector_store %arg8[%c0_10, %c0_11], %12 {strides = array<i32>} : memref<128x256xf32, #tpu.memory_space<vmem>>, vector<128x128xf32>,
      %c0_12 = arith.constant 0 : index
      %c0_13 = arith.constant 0 : index
      %14 = vector.load %arg4[%c0_12, %c0_13] : memref<128x128xbf16, #tpu.memory_space<vmem>>, vector<128x128xbf16>
      %15 = arith.extf %14 : vector<128x128xbf16> to vector<128x128xf32>
      %c0_14 = arith.constant 0 : index
      %c128 = arith.constant 128 : index
      %16 = vector.load %arg8[%c0_14, %c128] : memref<128x256xf32, #tpu.memory_space<vmem>>, vector<128x128xf32>
      tpu.vector_store %arg8[%c0_14, %c128], %15 {strides = array<i32>} : memref<128x256xf32, #tpu.memory_space<vmem>>, vector<128x128xf32>,
    } else {
    }
    %c0 = arith.constant 0 : index
    %c0_1 = arith.constant 0 : index
    %3 = vector.load %arg8[%c0, %c0_1] : memref<128x256xf32, #tpu.memory_space<vmem>>, vector<128x128xf32>
    %c0_2 = arith.constant 0 : index
    %c0_3 = arith.constant 0 : index
    %4 = vector.load %arg2[%c0_2, %c0_3] : memref<128x128xbf16, #tpu.memory_space<vmem>>, vector<128x128xbf16>
    %c0_4 = arith.constant 0 : index
    %c0_5 = arith.constant 0 : index
    %5 = vector.load %arg3[%c0_4, %c0_5] : memref<128x128xbf16, #tpu.memory_space<vmem>>, vector<128x128xbf16>
    %cst = arith.constant dense<0.000000e+00> : vector<128x128xf32>
    %6 = tpu.matmul %4, %5, %cst {dimension_numbers = #tpu.dot_dimension_numbers<[1], [0], [0], [1], [0, 0, 1, 1], [], []>} : vector<128x128xbf16>, vector<128x128xbf16>, vector<128x128xf32> -> vector<128x128xf32>
    %7 = arith.addf %3, %6 : vector<128x128xf32>
    %c0_6 = arith.constant 0 : index
    %c0_7 = arith.constant 0 : index
    %8 = vector.load %arg8[%c0_6, %c0_7] : memref<128x256xf32, #tpu.memory_space<vmem>>, vector<128x128xf32>
    tpu.vector_store %arg8[%c0_6, %c0_7], %7 {strides = array<i32>} : memref<128x256xf32, #tpu.memory_space<vmem>>, vector<128x128xf32>,
    %c2_i32 = arith.constant 2 : i32
    %9 = arith.cmpi eq, %arg1, %c2_i32 : i32
    %10 = arith.extui %9 : i1 to i32
    %c0_i32_8 = arith.constant 0 : i32
    %11 = arith.cmpi ne, %10, %c0_i32_8 : i32
    scf.if %11 {
      %c0_9 = arith.constant 0 : index
      %c0_10 = arith.constant 0 : index
      %12 = vector.load %arg8[%c0_9, %c0_10] : memref<128x256xf32, #tpu.memory_space<vmem>>, vector<128x256xf32>
      %13 = arith.truncf %12 : vector<128x256xf32> to vector<128x256xbf16>
      %c0_11 = arith.constant 0 : index
      %c0_12 = arith.constant 0 : index
      %14 = vector.load %arg5[%c0_11, %c0_12] : memref<256x128xbf16, #tpu.memory_space<vmem>>, vector<256x128xbf16>
      %cst_13 = arith.constant dense<0.000000e+00> : vector<128x128xf32>
      %15 = tpu.matmul %13, %14, %cst_13 {dimension_numbers = #tpu.dot_dimension_numbers<[1], [0], [0], [1], [0, 0, 1, 1], [], []>} : vector<128x256xbf16>, vector<256x128xbf16>, vector<128x128xf32> -> vector<128x128xf32>
      %c0_14 = arith.constant 0 : index
      %c0_15 = arith.constant 0 : index
      %16 = vector.load %arg6[%c0_14, %c0_15] : memref<1x128xf32, #tpu.memory_space<vmem>>, vector<1x128xf32>
      %17 = vector.broadcast %16 : vector<1x128xf32> to vector<128x128xf32>
      %18 = arith.addf %15, %17 : vector<128x128xf32>
      %cst_16 = arith.constant 0.000000e+00 : f32
      %19 = vector.broadcast %cst_16 : f32 to vector<128x128xf32>
      %20 = arith.maximumf %18, %19 : vector<128x128xf32>
      %21 = arith.truncf %20 : vector<128x128xf32> to vector<128x128xbf16>
      %c0_17 = arith.constant 0 : index
      %c0_18 = arith.constant 0 : index
      %22 = vector.load %arg7[%c0_17, %c0_18] : memref<128x128xbf16, #tpu.memory_space<vmem>>, vector<128x128xbf16>
      tpu.vector_store %arg7[%c0_17, %c0_18], %21 {strides = array<i32>} : memref<128x128xbf16, #tpu.memory_space<vmem>>, vector<128x128xbf16>,
    } else {
    }
    return
  }
  func.func @transform_0(%arg0: i32, %arg1: i32) -> (i32, i32) {
    %c0_i32 = arith.constant 0 : i32
    return %arg0, %arg1 : i32, i32
  }
  func.func @transform_1(%arg0: i32, %arg1: i32) -> (i32, i32) {
    %c0_i32 = arith.constant 0 : i32
    %c0_i32_0 = arith.constant 0 : i32
    return %arg1, %c0_i32 : i32, i32
  }
  func.func @transform_2(%arg0: i32, %arg1: i32) -> (i32, i32) {
    %c0_i32 = arith.constant 0 : i32
    %c0_i32_0 = arith.constant 0 : i32
    return %arg0, %c0_i32 : i32, i32
  }
  func.func @transform_3(%arg0: i32, %arg1: i32) -> (i32, i32) {
    %c0_i32 = arith.constant 0 : i32
    %c0_i32_0 = arith.constant 0 : i32
    %c0_i32_1 = arith.constant 0 : i32
    return %c0_i32, %c0_i32_0 : i32, i32
  }
  func.func @transform_4(%arg0: i32, %arg1: i32) -> (i32, i32) {
    %c0_i32 = arith.constant 0 : i32
    %c0_i32_0 = arith.constant 0 : i32
    %c0_i32_1 = arith.constant 0 : i32
    return %c0_i32, %c0_i32_0 : i32, i32
  }
  func.func @transform_5(%arg0: i32, %arg1: i32) -> (i32, i32) {
    %c0_i32 = arith.constant 0 : i32
    %c0_i32_0 = arith.constant 0 : i32
    return %arg0, %c0_i32 : i32, i32
  }
}

module attributes {stable_mosaic.version = 11 : i64} {
  func.func @kernel(%arg0: i32, %arg1: memref<128x128xbf16, #tpu.memory_space<vmem>>, %arg2: memref<128x128xbf16, #tpu.memory_space<vmem>>, %arg3: memref<128x128xbf16, #tpu.memory_space<vmem>>, %arg4: memref<128x128xbf16, #tpu.memory_space<vmem>>, %arg5: memref<128x128xbf16, #tpu.memory_space<vmem>>, %arg6: memref<128x128xbf16, #tpu.memory_space<vmem>>, %arg7: memref<1x128xf32, #tpu.memory_space<vmem>>, %arg8: memref<128x128xf32, #tpu.memory_space<vmem>>) attributes {dimension_semantics = [#tpu.dimension_semantics<parallel>], iteration_bounds = array<i64: 3>, scalar_prefetch = 0 : i64, scratch_operands = 0 : i64, tpu.core_type = #tpu.core_type<tc>, window_params = [{transform_indices = @transform_0, window_bounds = array<i64: 128, 128>}, {transform_indices = @transform_1, window_bounds = array<i64: 128, 128>}, {transform_indices = @transform_2, window_bounds = array<i64: 128, 128>}, {pipeline_mode = #tpu.pipeline_mode<synchronous>, transform_indices = @transform_3, window_bounds = array<i64: 128, 128>}, {pipeline_mode = #tpu.pipeline_mode<synchronous>, transform_indices = @transform_4, window_bounds = array<i64: 128, 128>}, {pipeline_mode = #tpu.pipeline_mode<synchronous>, transform_indices = @transform_5, window_bounds = array<i64: 128, 128>}, {pipeline_mode = #tpu.pipeline_mode<synchronous>, transform_indices = @transform_6, window_bounds = array<i64: 1, 128>}, {transform_indices = @transform_7, window_bounds = array<i64: 128, 128>}]} {
    %c0 = arith.constant 0 : index
    %c0_0 = arith.constant 0 : index
    %0 = vector.load %arg1[%c0, %c0_0] : memref<128x128xbf16, #tpu.memory_space<vmem>>, vector<128x128xbf16>
    %c0_1 = arith.constant 0 : index
    %c0_2 = arith.constant 0 : index
    %1 = vector.load %arg4[%c0_1, %c0_2] : memref<128x128xbf16, #tpu.memory_space<vmem>>, vector<128x128xbf16>
    %cst = arith.constant dense<0.000000e+00> : vector<128x128xf32>
    %2 = tpu.matmul %0, %1, %cst {dimension_numbers = #tpu.dot_dimension_numbers<[1], [0], [0], [1], [0, 0, 1, 1], [], []>} : vector<128x128xbf16>, vector<128x128xbf16>, vector<128x128xf32> -> vector<128x128xf32>
    %c0_3 = arith.constant 0 : index
    %c0_4 = arith.constant 0 : index
    %3 = vector.load %arg2[%c0_3, %c0_4] : memref<128x128xbf16, #tpu.memory_space<vmem>>, vector<128x128xbf16>
    %c0_5 = arith.constant 0 : index
    %c0_6 = arith.constant 0 : index
    %4 = vector.load %arg5[%c0_5, %c0_6] : memref<128x128xbf16, #tpu.memory_space<vmem>>, vector<128x128xbf16>
    %cst_7 = arith.constant dense<0.000000e+00> : vector<128x128xf32>
    %5 = tpu.matmul %3, %4, %cst_7 {dimension_numbers = #tpu.dot_dimension_numbers<[1], [0], [0], [1], [0, 0, 1, 1], [], []>} : vector<128x128xbf16>, vector<128x128xbf16>, vector<128x128xf32> -> vector<128x128xf32>
    %6 = arith.addf %2, %5 : vector<128x128xf32>
    %c0_8 = arith.constant 0 : index
    %c0_9 = arith.constant 0 : index
    %7 = vector.load %arg3[%c0_8, %c0_9] : memref<128x128xbf16, #tpu.memory_space<vmem>>, vector<128x128xbf16>
    %c0_10 = arith.constant 0 : index
    %c0_11 = arith.constant 0 : index
    %8 = vector.load %arg6[%c0_10, %c0_11] : memref<128x128xbf16, #tpu.memory_space<vmem>>, vector<128x128xbf16>
    %cst_12 = arith.constant dense<0.000000e+00> : vector<128x128xf32>
    %9 = tpu.matmul %7, %8, %cst_12 {dimension_numbers = #tpu.dot_dimension_numbers<[1], [0], [0], [1], [0, 0, 1, 1], [], []>} : vector<128x128xbf16>, vector<128x128xbf16>, vector<128x128xf32> -> vector<128x128xf32>
    %10 = arith.addf %6, %9 : vector<128x128xf32>
    %c0_13 = arith.constant 0 : index
    %c0_14 = arith.constant 0 : index
    %11 = vector.load %arg7[%c0_13, %c0_14] : memref<1x128xf32, #tpu.memory_space<vmem>>, vector<1x128xf32>
    %12 = vector.broadcast %11 : vector<1x128xf32> to vector<128x128xf32>
    %13 = arith.addf %10, %12 : vector<128x128xf32>
    %14 = tpu.iota {dimensions = array<i32: 1>} : vector<128x128xi32>
    %c8_i32 = arith.constant 8 : i32
    %15 = vector.broadcast %c8_i32 : i32 to vector<128x128xi32>
    %16 = arith.cmpi slt, %14, %15 : vector<128x128xi32>
    %cst_15 = arith.constant -1.000000e+30 : f32
    %17 = vector.broadcast %cst_15 : f32 to vector<128x128xf32>
    %18 = arith.select %16, %13, %17 : vector<128x128xi1>, vector<128x128xf32>
    %cst_16 = arith.constant dense<0xFF800000> : vector<128xf32>
    %19 = vector.multi_reduction <maximumf>, %18, %cst_16 [1] : vector<128x128xf32> to vector<128xf32>
    %20 = vector.shape_cast %19 : vector<128xf32> to vector<128x1xf32>
    %21 = vector.broadcast %20 : vector<128x1xf32> to vector<128x128xf32>
    %22 = arith.subf %18, %21 : vector<128x128xf32>
    %23 = math.exp %22 : vector<128x128xf32>
    %cst_17 = arith.constant dense<0.000000e+00> : vector<128xf32>
    %24 = vector.multi_reduction <add>, %23, %cst_17 [1] : vector<128x128xf32> to vector<128xf32>
    %25 = vector.shape_cast %24 : vector<128xf32> to vector<128x1xf32>
    %26 = tpu.reciprocal %25 {approx = true} : vector<128x1xf32> -> vector<128x1xf32>
    %27 = vector.broadcast %26 : vector<128x1xf32> to vector<128x128xf32>
    %28 = arith.mulf %23, %27 : vector<128x128xf32>
    %c0_18 = arith.constant 0 : index
    %c0_19 = arith.constant 0 : index
    %29 = vector.load %arg8[%c0_18, %c0_19] : memref<128x128xf32, #tpu.memory_space<vmem>>, vector<128x128xf32>
    tpu.vector_store %arg8[%c0_18, %c0_19], %28 {strides = array<i32>} : memref<128x128xf32, #tpu.memory_space<vmem>>, vector<128x128xf32>,
    return
  }
  func.func @transform_0(%arg0: i32) -> (i32, i32) {
    %c0_i32 = arith.constant 0 : i32
    %c0_i32_0 = arith.constant 0 : i32
    return %arg0, %c0_i32 : i32, i32
  }
  func.func @transform_1(%arg0: i32) -> (i32, i32) {
    %c0_i32 = arith.constant 0 : i32
    %c0_i32_0 = arith.constant 0 : i32
    return %arg0, %c0_i32 : i32, i32
  }
  func.func @transform_2(%arg0: i32) -> (i32, i32) {
    %c0_i32 = arith.constant 0 : i32
    %c0_i32_0 = arith.constant 0 : i32
    return %arg0, %c0_i32 : i32, i32
  }
  func.func @transform_3(%arg0: i32) -> (i32, i32) {
    %c0_i32 = arith.constant 0 : i32
    %c0_i32_0 = arith.constant 0 : i32
    %c0_i32_1 = arith.constant 0 : i32
    return %c0_i32, %c0_i32_0 : i32, i32
  }
  func.func @transform_4(%arg0: i32) -> (i32, i32) {
    %c0_i32 = arith.constant 0 : i32
    %c0_i32_0 = arith.constant 0 : i32
    %c0_i32_1 = arith.constant 0 : i32
    return %c0_i32, %c0_i32_0 : i32, i32
  }
  func.func @transform_5(%arg0: i32) -> (i32, i32) {
    %c0_i32 = arith.constant 0 : i32
    %c0_i32_0 = arith.constant 0 : i32
    %c0_i32_1 = arith.constant 0 : i32
    return %c0_i32, %c0_i32_0 : i32, i32
  }
  func.func @transform_6(%arg0: i32) -> (i32, i32) {
    %c0_i32 = arith.constant 0 : i32
    %c0_i32_0 = arith.constant 0 : i32
    %c0_i32_1 = arith.constant 0 : i32
    return %c0_i32, %c0_i32_0 : i32, i32
  }
  func.func @transform_7(%arg0: i32) -> (i32, i32) {
    %c0_i32 = arith.constant 0 : i32
    %c0_i32_0 = arith.constant 0 : i32
    return %arg0, %c0_i32 : i32, i32
  }
}

</mosaic_0001>

<bundles_post_ra>
// kernel: jknet_forward.4
= control target key start
LH: loop header
LB: loop body
LE: loop exit
PB: predicated region body
PF: predicated region fallthrough
CT: control target
= control target key end

     0   :  { %s1705_s18 = smov 0   ;;  %s1707_s19 = smov 0   ;;  %s1929_s0 = inlined_call_operand.vmem [shape: bf16[384,384], index: 0, kind: input, shape index: {}]   ;;  %s1930_s1 = inlined_call_operand.vmem [shape: bf16[384,128], index: 1, kind: input, shape index: {}, may-alias: {1,2}]   ;;  %s1931_s2 = inlined_call_operand.vmem [shape: bf16[384,128], index: 2, kind: input, shape index: {}, may-alias: {1,2}]   ;;  %s1932_s3 = inlined_call_operand.vmem [shape: bf16[256,128], index: 3, kind: input, shape index: {}]   ;;  %s1933_s4 = inlined_call_operand.vmem [shape: f32[1,128], index: 4, kind: input, shape index: {}]   ;;  %s1934_s5 = inlined_call_operand.vmem [shape: bf16[384,128], index: 5, kind: output, shape index: {}]  }
   0x1   :  { %s1709_s20 = smov 0   ;;  %s1711_s21 = smov 0  }
   0x2   :  { %s1713_s22 = smov 0   ;;  %s1715_s23 = smov 0  }
   0x3   :  { %s1717_s24 = smov 0  }
   0x4 LB: > { %s24_s25 = sadd.s32 1, %s1664_s22  ;;  %s27_s26 = sadd.s32 1, %s1668_s23  ;;  %s1672_s24 = sphi %s1717_s24, %s15_s24   ;;  %s1668_s23 = sphi %s1715_s23, %s1940_s23   ;;  %s1664_s22 = sphi %s1713_s22, %s1939_s22   ;;  %s1660_s21 = sphi %s1711_s21, %s1938_s21   ;;  %s1656_s20 = sphi %s1709_s20, %s1937_s20   ;;  %s1652_s19 = sphi %s1707_s19, %s1936_s19   ;;  %s1648_s18 = sphi %s1705_s18, %s1935_s18  }
   0x5   : > { %p25_p0 = scmp.ge.s32.totalorder %s24_s25, 3  ;;  %p43_p1 = scmp.ne.s32.totalorder %s1652_s19, %s1648_s18 }
   0x6   : > { %p44_p2 = scmp.eq.s32.totalorder %s1672_s24, 0  ;;  %s36_s30 = sadd.s32 1, %s1652_s19 }
   0x7   : > { %s1942_s25 = smov (%p25_p0, %s24_s25), 0  ;;  %s1944_s26 = smov (!%p25_p0, %s27_s26), %s1668_s23 }
   0x8   : > { %p45_p3 = por %p44_p2, %p43_p1  ;;  %p29_p4 = scmp.ge.s32.totalorder %s1944_s26, 3 }
   0x9   : > { %s32_s27 = ssub.s32 %s1664_s22, %s1942_s25  ;;  %p1216_p6 = scmp.ge.s32.totalorder %s1672_s24, 9 }
   0xa   : > { %s1946_s26 = smov (%p29_p4, %s1944_s26), 0 }
   0xb   : > { %s31_s28 = ssub.s32 %s1668_s23, %s1946_s26  ;;  %195 = sbr.rel (%p1216_p6) target bundleno = 33 (0x21), region = 24 }
   0xc   : > { %s33_s29 = sor.u32 %s32_s27, %s31_s28 }
   0xd   : > { %p34_p5 = scmp.eq.s32.totalorder %s33_s29, 0 }
   0xf   : > { %s1756_s6 = scalar_select %p34_p5, %s1652_s19, %s36_s30  }
  0x10   : > { %198 = sbr.rel (!%p45_p3) target bundleno = 33 (0x21), region = 28  ;;  %s200_s7 = sand.u32 (%p45_p3), 1, %s1652_s19  }
  0x11   : > { %s1528_s8 = smul.u32 (%p45_p3), 48, %s1668_s23  ;;  %s1217_s9 = sshll.u32 (%p45_p3), %s200_s7, 6 }
  0x12   : > { %s202_s15 = scalar_lea.vmem (%p45_p3), [#allocation3], %s1217_s9 }
  0x13   : > { %s205_s10 = sadd.s32 (%p45_p3), %s1664_s22, %s1528_s8 }
  0x14   : > { %s1220_s11 = sshll.u32 (%p45_p3), %s205_s10, 2 }
  0x15   : > { %s1765_s14 = scalar_lea.vmem %s1929_s0, %s1220_s11 }
  0x16   : > { %v224_v0 = vld [vmem:[%s1765_s14] sm:$0xf]  ;;  %v226_v1 = vld [vmem:[%s1765_s14 + $0xc] sm:$0xf]  ;;  %v228_v2 = vld [vmem:[%s1765_s14 + $0x18] sm:$0xf] }
  0x17   : > { %225 = vst [vmem:[%s202_s15] sm:$0xf] %v224_v0  ;;  %227 = vst [vmem:[%s202_s15 + $0x4] sm:$0xf] %v226_v1  ;;  %v230_v3 = vld [vmem:[%s1765_s14 + $0x24] sm:$0xf] }
  0x18   : > { %229 = vst [vmem:[%s202_s15 + $0x8] sm:$0xf] %v228_v2  ;;  %v232_v4 = vld [vmem:[%s1765_s14 + $0x30] sm:$0xf]  ;;  %v234_v5 = vld [vmem:[%s1765_s14 + $0x3c] sm:$0xf] }
  0x19   : > { %231 = vst [vmem:[%s202_s15 + $0xc] sm:$0xf] %v230_v3  ;;  %233 = vst [vmem:[%s202_s15 + $0x10] sm:$0xf] %v232_v4  ;;  %v236_v6 = vld [vmem:[%s1765_s14 + $0x48] sm:$0xf] }
  0x1a   : > { %235 = vst [vmem:[%s202_s15 + $0x14] sm:$0xf] %v234_v5  ;;  %v238_v7 = vld [vmem:[%s1765_s14 + $0x54] sm:$0xf]  ;;  %v240_v8 = vld [vmem:[%s1765_s14 + $0x60] sm:$0xf] }
  0x1b   : > { %237 = vst [vmem:[%s202_s15 + $0x18] sm:$0xf] %v236_v6  ;;  %239 = vst [vmem:[%s202_s15 + $0x1c] sm:$0xf] %v238_v7  ;;  %v242_v9 = vld [vmem:[%s1765_s14 + $0x6c] sm:$0xf] }
  0x1c   : > { %241 = vst [vmem:[%s202_s15 + $0x20] sm:$0xf] %v240_v8  ;;  %v244_v10 = vld [vmem:[%s1765_s14 + $0x78] sm:$0xf]  ;;  %v246_v11 = vld [vmem:[%s1765_s14 + $0x84] sm:$0xf] }
  0x1d   : > { %243 = vst [vmem:[%s202_s15 + $0x24] sm:$0xf] %v242_v9  ;;  %245 = vst [vmem:[%s202_s15 + $0x28] sm:$0xf] %v244_v10  ;;  %v248_v12 = vld [vmem:[%s1765_s14 + $0x90] sm:$0xf] }
  0x1e   : > { %247 = vst [vmem:[%s202_s15 + $0x2c] sm:$0xf] %v246_v11  ;;  %v250_v13 = vld [vmem:[%s1765_s14 + $0x9c] sm:$0xf]  ;;  %v252_v14 = vld [vmem:[%s1765_s14 + $0xa8] sm:$0xf] }
  0x1f   : > { %249 = vst [vmem:[%s202_s15 + $0x30] sm:$0xf] %v248_v12  ;;  %251 = vst [vmem:[%s202_s15 + $0x34] sm:$0xf] %v250_v13  ;;  %v254_v15 = vld [vmem:[%s1765_s14 + $0xb4] sm:$0xf] }
  0x20   : > { %253 = vst [vmem:[%s202_s15 + $0x38] sm:$0xf] %v252_v14  ;;  %255 = vst [vmem:[%s202_s15 + $0x3c] sm:$0xf] %v254_v15 }
  0x21 PF: > { %p1221_p7 = scmp.ge.s32.totalorder %s1672_s24, 1  ;;  %p328_p8 = scmp.lt.s32.totalorder %s1672_s24, 10 }
  0x23   : > { %p329_p9 = pnand %p1221_p7, %p328_p8 }
  0x24   : > { %s335_s16 = sand.u32 (!%p329_p9), 1, %s1648_s18   ;;  %s1223_s17 = sshll.u32 (!%p329_p9), %s1656_s20, 4 }
  0x25   : > { %332 = sbr.rel (%p329_p9) target bundleno = 575 (0x23f), region = 77  ;;  %s1222_s27 = sshll.u32 (!%p329_p9), %s335_s16, 6 }
  0x26   : > { %p374_p10 = scmp.lt.s32.totalorder (!%p329_p9), %s1223_s17, 47  ;;  %s1225_s28 = sshll.u32 (!%p329_p9), %s1660_s21, 4 }
  0x27   : > { %p380_p11 = scmp.lt.s32.totalorder (!%p329_p9), %s1225_s28, 47  ;;  %s1803_s21 = scalar_lea.vmem (!%p329_p9), [#allocation3], %s1222_s27 }
  0x28   : > { %p1229_p12 = scmp.ne.s32.totalorder (!%p329_p9), %s1656_s20, 0 }
  0x2a   : > { %s1948_s17 = smov (!%p374_p10, %s1223_s17), 47  ;;  %s1950_s28 = smov (!%p380_p11, %s1225_s28), 47 }
  0x2b   : > { %s1224_s29 = sshll.u32 %s1948_s17, 2  ;;  %s1226_s9 = sshll.u32 %s1950_s28, 2 }
  0x2c   : > { %s1791_s8 = scalar_lea.vmem %s1930_s1, %s1224_s29  ;;  %s1796_s12 = scalar_lea.vmem %s1931_s2, %s1226_s9 }
  0x2d   : > { %s1801_s14 = scalar_lea.vmem %s1934_s5, %s1226_s9  ;;  %395 = sbr.rel (%p1229_p12) target bundleno = 67 (0x43), region = 85 }
  0x32   : > { %v1299_v16 = vld [vmem:[%s1796_s12] sm:$0xff]   ;;  %v1370_v17 = vld [vmem:[%s1796_s12 + $0x8] sm:$0xff]   ;;  %v1371_v18 = vld [vmem:[%s1796_s12 + $0x10] sm:$0xff]   ;;  %v1674_v19 = vmov 0.0  }
  0x33   : > { %396 = vst [vmem:[#allocation2 + $0x68] sm:$0xff] %v1674_v19  ;;  %397 = vst [vmem:[#allocation2] sm:$0xff] %v1674_v19  ;;  %v1300_v20 = vunpack.c.l.bf16 %v1299_v16  ;;  %v1301_v21 = vunpack.c.h.bf16 %v1299_v16  ;;  %v1304_v22 = vunpack.c.l.bf16 %v1370_v17  ;;  %v1305_v23 = vunpack.c.h.bf16 %v1370_v17  ;;  %v1372_v24 = vld [vmem:[%s1796_s12 + $0x18] sm:$0xff]   ;;  %v1373_v25 = vld [vmem:[%s1796_s12 + $0x20] sm:$0xff]  }
  0x34   : > { %398 = vst [vmem:[#allocation2 + $0xb8] sm:$0xff] %v1674_v19  ;;  %399 = vst [vmem:[#allocation2 + $0x30] sm:$0xff] %v1674_v19  ;;  %v1374_v26 = vld [vmem:[%s1796_s12 + $0x28] sm:$0xff]   ;;  %v1308_v27 = vunpack.c.l.bf16 %v1371_v18  ;;  %v1309_v28 = vunpack.c.h.bf16 %v1371_v18  ;;  %v1312_v29 = vunpack.c.l.bf16 %v1372_v24  ;;  %v1313_v30 = vunpack.c.h.bf16 %v1372_v24  ;;  %v1375_v31 = vld [vmem:[%s1796_s12 + $0x30] sm:$0xff]  }
  0x35   : > { %400 = vst [vmem:[#allocation2 + $0xa0] sm:$0xff] %v1674_v19  ;;  %401 = vst [vmem:[#allocation2 + $0xd0] sm:$0xff] %v1674_v19  ;;  %v1376_v32 = vld [vmem:[%s1796_s12 + $0x38] sm:$0xff]   ;;  %v1316_v33 = vunpack.c.l.bf16 %v1373_v25  ;;  %v1317_v34 = vunpack.c.h.bf16 %v1373_v25  ;;  %v1320_v35 = vunpack.c.l.bf16 %v1374_v26  ;;  %v1321_v36 = vunpack.c.h.bf16 %v1374_v26 }
  0x36   : > { %402 = vst [vmem:[#allocation2 + $0x60] sm:$0xff] %v1674_v19  ;;  %403 = vst [vmem:[#allocation2 + $0x90] sm:$0xff] %v1674_v19  ;;  %v1324_v37 = vunpack.c.l.bf16 %v1375_v31  ;;  %v1325_v38 = vunpack.c.h.bf16 %v1375_v31  ;;  %v1328_v39 = vunpack.c.l.bf16 %v1376_v32  ;;  %v1329_v40 = vunpack.c.h.bf16 %v1376_v32 }
  0x37   : > { %404 = vst [vmem:[#allocation2 + $0x8] sm:$0xff] %v1674_v19  ;;  %405 = vst [vmem:[#allocation2 + $0x18] sm:$0xff] %v1674_v19 }
  0x38   : > { %406 = vst [vmem:[#allocation2 + $0xd8] sm:$0xff] %v1674_v19  ;;  %407 = vst [vmem:[#allocation2 + $0x78] sm:$0xff] %v1674_v19 }
  0x39   : > { %408 = vst [vmem:[#allocation2 + $0xc0] sm:$0xff] %v1674_v19  ;;  %409 = vst [vmem:[#allocation2 + $0xe8] sm:$0xff] %v1674_v19 }
  0x3a   : > { %410 = vst [vmem:[#allocation2 + $0x10] sm:$0xff] %v1674_v19  ;;  %411 = vst [vmem:[#allocation2 + $0xf0] sm:$0xff] %v1674_v19 }
  0x3b   : > { %444 = vst [vmem:[#allocation2 + $0x70] sm:$0xff] %v1300_v20  ;;  %445 = vst [vmem:[#allocation2 + $0xb0] sm:$0xff] %v1301_v21 }
  0x3c   : > { %446 = vst [vmem:[#allocation2 + $0x80] sm:$0xff] %v1304_v22  ;;  %447 = vst [vmem:[#allocation2 + $0x98] sm:$0xff] %v1305_v23 }
  0x3d   : > { %448 = vst [vmem:[#allocation2 + $0xc8] sm:$0xff] %v1308_v27  ;;  %449 = vst [vmem:[#allocation2 + $0x28] sm:$0xff] %v1309_v28 }
  0x3e   : > { %450 = vst [vmem:[#allocation2 + $0xe0] sm:$0xff] %v1312_v29  ;;  %451 = vst [vmem:[#allocation2 + $0x88] sm:$0xff] %v1313_v30 }
  0x3f   : > { %452 = vst [vmem:[#allocation2 + $0x58] sm:$0xff] %v1316_v33  ;;  %453 = vst [vmem:[#allocation2 + $0xa8] sm:$0xff] %v1317_v34 }
  0x40   : > { %454 = vst [vmem:[#allocation2 + $0x20] sm:$0xff] %v1320_v35  ;;  %455 = vst [vmem:[#allocation2 + $0x50] sm:$0xff] %v1321_v36 }
  0x41   : > { %456 = vst [vmem:[#allocation2 + $0x48] sm:$0xff] %v1324_v37  ;;  %457 = vst [vmem:[#allocation2 + $0xf8] sm:$0xff] %v1325_v38 }
  0x42   : > { %458 = vst [vmem:[#allocation2 + $0x40] sm:$0xff] %v1328_v39  ;;  %459 = vst [vmem:[#allocation2 + $0x38] sm:$0xff] %v1329_v40 }
  0x43 PF: > { %v1586_v41 = vld [vmem:[%s1791_s8 + $0x38] sm:$0xff]   ;;  %v1587_v42 = vld [vmem:[%s1791_s8 + $0x30] sm:$0xff]   ;;  %v1588_v43 = vld [vmem:[%s1791_s8 + $0x28] sm:$0xff]   ;;  %p1246_p13 = scmp.ne.s32.totalorder %s1656_s20, 2 }
  0x44   : > { %1464 = vmatprep.subr.bf16.mxu0 %v1586_v41  ;;  %1496 = vmatprep.subr.bf16.mxu1 %v1586_v41  ;;  %v1589_v44 = vld [vmem:[%s1791_s8 + $0x20] sm:$0xff]   ;;  %v1590_v47 = vld [vmem:[%s1791_s8 + $0x18] sm:$0xff]   ;;  %v1591_v48 = vld [vmem:[%s1791_s8 + $0x10] sm:$0xff]  }
  0x45   : > { %1465 = vmatpush3.bf16.msra.mxu0 %v1586_v41  ;;  %1504 = vmatpush3.bf16.msra.mxu1 %v1586_v41  ;;  %v1594_v45 = vld [vmem:[%s1803_s21] sm:$0xff]   ;;  %v1592_v49 = vld [vmem:[%s1791_s8 + $0x8] sm:$0xff]   ;;  %v1598_v53 = vld [vmem:[%s1803_s21 + $0x10] sm:$0xff]  }
  0x46   : > { %1466 = vmatprep.subr.bf16.mxu0 %v1587_v42  ;;  %1497 = vmatprep.subr.bf16.mxu1 %v1587_v42  ;;  %v1595_v46 = vld [vmem:[%s1803_s21 + $0x20] sm:$0xff]   ;;  %v1596_v51 = vld [vmem:[%s1803_s21 + $0x8] sm:$0xff]   ;;  %v1599_v54 = vld [vmem:[%s1803_s21 + $0x30] sm:$0xff]  }
  0x47   : > { %1480 = vmatprep.mubr.bf16.mxu0 %v1594_v45  ;;  %1488 = vmatprep.mubr.bf16.mxu1 %v1595_v46  ;;  %v1593_v50 = vld [vmem:[%s1791_s8] sm:$0xff]   ;;  %v1597_v52 = vld [vmem:[%s1803_s21 + $0x28] sm:$0xff]   ;;  %v1600_v55 = vld [vmem:[%s1803_s21 + $0x18] sm:$0xff]  }
  0x48   : > { %v1601_v56 = vld [vmem:[%s1803_s21 + $0x38] sm:$0xff]   ;;  %v460_v61 = vld [vmem:[#allocation2 + $0x68] sm:$0xff]  ;;  %v463_v3 = vld [vmem:[#allocation2 + $0x30] sm:$0xff] }
  0x49   : > { %1467 = vmatpush3.bf16.msra.mxu0 %v1587_v42  ;;  %1505 = vmatpush3.bf16.msra.mxu1 %v1587_v42  ;;  %v462_v57 = vld [vmem:[#allocation2 + $0xb8] sm:$0xff]  ;;  %v468_v62 = vld [vmem:[#allocation2 + $0x8] sm:$0xff]  ;;  %v461_v9 = vld [vmem:[#allocation2] sm:$0xff] }
  0x4a   : > { %1468 = vmatprep.subr.bf16.mxu0 %v1588_v43  ;;  %1498 = vmatprep.subr.bf16.mxu1 %v1588_v43  ;;  %v470_v58 = vld [vmem:[#allocation2 + $0xd8] sm:$0xff]  ;;  %v466_v15 = vld [vmem:[#allocation2 + $0x60] sm:$0xff]  ;;  %v474_v16 = vld [vmem:[#allocation2 + $0x10] sm:$0xff] }
  0x4b   : > { %v471_v4 = vld [vmem:[#allocation2 + $0x78] sm:$0xff]  ;;  %v464_v21 = vld [vmem:[#allocation2 + $0xa0] sm:$0xff]  ;;  %v467_v27 = vld [vmem:[#allocation2 + $0x90] sm:$0xff] }
  0x4c   : > { %v469_v10 = vld [vmem:[#allocation2 + $0x18] sm:$0xff]  ;;  %v472_v22 = vld [vmem:[#allocation2 + $0xc0] sm:$0xff]  ;;  %v475_v28 = vld [vmem:[#allocation2 + $0xf0] sm:$0xff] }
  0x4d   : > { %1469 = vmatpush3.bf16.msra.mxu0 %v1588_v43  ;;  %1506 = vmatpush3.bf16.msra.mxu1 %v1588_v43  ;;  %v465_v33 = vld [vmem:[#allocation2 + $0xd0] sm:$0xff]  ;;  %v473_v34 = vld [vmem:[#allocation2 + $0xe8] sm:$0xff] }
  0x4e   : > { %1470 = vmatprep.subr.bf16.mxu0 %v1589_v44  ;;  %1499 = vmatprep.subr.bf16.mxu1 %v1589_v44 }
  0x51   : > { %1471 = vmatpush3.bf16.msra.mxu0 %v1589_v44  ;;  %1507 = vmatpush3.bf16.msra.mxu1 %v1589_v44 }
  0x52   : > { %1472 = vmatprep.subr.bf16.mxu0 %v1590_v47  ;;  %1500 = vmatprep.subr.bf16.mxu1 %v1590_v47 }
  0x55   : > { %1473 = vmatpush3.bf16.msra.mxu0 %v1590_v47  ;;  %1508 = vmatpush3.bf16.msra.mxu1 %v1590_v47 }
  0x56   : > { %1474 = vmatprep.subr.bf16.mxu0 %v1591_v48  ;;  %1501 = vmatprep.subr.bf16.mxu1 %v1591_v48 }
  0x59   : > { %1475 = vmatpush3.bf16.msra.mxu0 %v1591_v48  ;;  %1509 = vmatpush3.bf16.msra.mxu1 %v1591_v48 }
  0x5a   : > { %1476 = vmatprep.subr.bf16.mxu0 %v1592_v49  ;;  %1502 = vmatprep.subr.bf16.mxu1 %v1592_v49 }
  0x5d   : > { %1477 = vmatpush3.bf16.msra.mxu0 %v1592_v49  ;;  %1510 = vmatpush3.bf16.msra.mxu1 %v1592_v49 }
  0x5e   : > { %1478 = vmatprep.subr.bf16.mxu0 %v1593_v50  ;;  %1503 = vmatprep.subr.bf16.mxu1 %v1593_v50 }
  0x61   : > { %1479 = vmatpush3.bf16.msra.mxu0 %v1593_v50  ;;  %1511 = vmatpush3.bf16.msra.mxu1 %v1593_v50 }
  0x64   : > { %1481 = vmatmul.mubr.bf16.vlgmr.msra.gmra.mxu0 %v1596_v51  ;;  %1489 = vmatmul.mubr.bf16.vlgmr.msra.gmra.mxu1 %v1597_v52 }
  0x65   : > { %1484 = vmatprep.mubr.bf16.mxu0 %v1598_v53  ;;  %1492 = vmatprep.mubr.bf16.mxu1 %v1599_v54 }
  0x6c   : > { %1485 = vmatmul.mubr.bf16.gmra.mxu0 %v1600_v55  ;;  %1493 = vmatmul.mubr.bf16.gmra.mxu1 %v1601_v56 }
 0x124   : > { %v1482_v59 = vpop.f32.mrf.mxu0  ;;  %v1490_v60 = vpop.f32.mrf.mxu1 }
 0x125   : > { %v703_v63 = vadd.f32 %v1482_v59, %v462_v57  ;;  %v711_v0 = vadd.f32 %v1490_v60, %v470_v58 }
 0x126   : > { %v638_v1 = vpop.f32.mrf.mxu0  ;;  %v670_v2 = vpop.f32.mrf.mxu1 }
 0x127   : > { %719 = vst [vmem:[#allocation2 + $0xb8] sm:$0xff] %v703_v63  ;;  %727 = vst [vmem:[#allocation2 + $0xd8] sm:$0xff] %v711_v0  ;;  %v701_v5 = vadd.f32 %v638_v1, %v460_v61  ;;  %v709_v6 = vadd.f32 %v670_v2, %v468_v62 }
 0x128   : > { %v1483_v7 = vpop.f32.mrf.mxu0  ;;  %v1491_v8 = vpop.f32.mrf.mxu1 }
 0x129   : > { %717 = vst [vmem:[#allocation2 + $0x68] sm:$0xff] %v701_v5  ;;  %725 = vst [vmem:[#allocation2 + $0x8] sm:$0xff] %v709_v6  ;;  %v704_v11 = vadd.f32 %v1483_v7, %v463_v3  ;;  %v712_v12 = vadd.f32 %v1491_v8, %v471_v4 }
 0x12a   : > { %v641_v13 = vpop.f32.mrf.mxu0  ;;  %v673_v14 = vpop.f32.mrf.mxu1 }
 0x12b   : > { %720 = vst [vmem:[#allocation2 + $0x30] sm:$0xff] %v704_v11  ;;  %728 = vst [vmem:[#allocation2 + $0x78] sm:$0xff] %v712_v12  ;;  %v702_v17 = vadd.f32 %v641_v13, %v461_v9  ;;  %v710_v18 = vadd.f32 %v673_v14, %v469_v10 }
 0x12c   : > { %v1486_v19 = vpop.f32.mrf.mxu0  ;;  %v1494_v20 = vpop.f32.mrf.mxu1 }
 0x12d   : > { %718 = vst [vmem:[#allocation2] sm:$0xff] %v702_v17  ;;  %726 = vst [vmem:[#allocation2 + $0x18] sm:$0xff] %v710_v18  ;;  %v707_v23 = vadd.f32 %v1486_v19, %v466_v15  ;;  %v715_v24 = vadd.f32 %v1494_v20, %v474_v16 }
 0x12e   : > { %v654_v25 = vpop.f32.mrf.mxu0  ;;  %v686_v26 = vpop.f32.mrf.mxu1 }
 0x12f   : > { %723 = vst [vmem:[#allocation2 + $0x60] sm:$0xff] %v707_v23  ;;  %731 = vst [vmem:[#allocation2 + $0x10] sm:$0xff] %v715_v24  ;;  %v705_v29 = vadd.f32 %v654_v25, %v464_v21  ;;  %v713_v30 = vadd.f32 %v686_v26, %v472_v22 }
 0x130   : > { %v1487_v31 = vpop.f32.mrf.mxu0  ;;  %v1495_v32 = vpop.f32.mrf.mxu1 }
 0x131   : > { %721 = vst [vmem:[#allocation2 + $0xa0] sm:$0xff] %v705_v29  ;;  %729 = vst [vmem:[#allocation2 + $0xc0] sm:$0xff] %v713_v30  ;;  %v708_v35 = vadd.f32 %v1487_v31, %v467_v27  ;;  %v716_v36 = vadd.f32 %v1495_v32, %v475_v28  ;;  %736 = sbr.rel (%p1246_p13) target bundleno = 575 (0x23f), region = 89 }
 0x132   : > { %v657_v37 = vpop.f32.mrf.mxu0  ;;  %v689_v38 = vpop.f32.mrf.mxu1 }
 0x133   : > { %724 = vst [vmem:[#allocation2 + $0x90] sm:$0xff] %v708_v35  ;;  %732 = vst [vmem:[#allocation2 + $0xf0] sm:$0xff] %v716_v36  ;;  %v706_v39 = vadd.f32 %v657_v37, %v465_v33  ;;  %v714_v40 = vadd.f32 %v689_v38, %v473_v34 }
 0x135   : > { %722 = vst [vmem:[#allocation2 + $0xd0] sm:$0xff] %v706_v39  ;;  %730 = vst [vmem:[#allocation2 + $0xe8] sm:$0xff] %v714_v40 }
 0x136   : > { %v1602_v41 = vld [vmem:[%s1932_s3 + $0x78] sm:$0xff]   ;;  %v1604_v43 = vld [vmem:[%s1932_s3 + $0x70] sm:$0xff]   ;;  %v1606_v45 = vld [vmem:[%s1932_s3 + $0x68] sm:$0xff]  }
 0x137   : > { %v1603_v42 = vld [vmem:[%s1932_s3 + $0x38] sm:$0xff]   ;;  %1400 = vmatprep.subr.bf16.mxu0 %v1602_v41  ;;  %1512 = vmatprep.subr.bf16.mxu1 %v1602_v41  ;;  %v1605_v44 = vld [vmem:[%s1932_s3 + $0x30] sm:$0xff]   ;;  %v1607_v46 = vld [vmem:[%s1932_s3 + $0x28] sm:$0xff]  }
 0x138   : > { %1401 = vmatpush3.bf16.msra.mxu0 %v1603_v42  ;;  %1520 = vmatpush3.bf16.msra.mxu1 %v1603_v42  ;;  %v1608_v47 = vld [vmem:[%s1932_s3 + $0x60] sm:$0xff]   ;;  %v1610_v49 = vld [vmem:[%s1932_s3 + $0x58] sm:$0xff]   ;;  %v1612_v51 = vld [vmem:[%s1932_s3 + $0x50] sm:$0xff]  }
 0x139   : > { %1402 = vmatprep.subr.bf16.mxu0 %v1604_v43  ;;  %1513 = vmatprep.subr.bf16.mxu1 %v1604_v43  ;;  %v1609_v48 = vld [vmem:[%s1932_s3 + $0x20] sm:$0xff]   ;;  %v1611_v50 = vld [vmem:[%s1932_s3 + $0x18] sm:$0xff]   ;;  %v738_v52 = vld [vmem:[#allocation2 + $0x70] sm:$0xff] }
 0x13a   : > { %v740_v53 = vld [vmem:[#allocation2 + $0xb0] sm:$0xff]  ;;  %v754_v54 = vld [vmem:[#allocation2 + $0x58] sm:$0xff]  ;;  %v756_v56 = vld [vmem:[#allocation2 + $0xa8] sm:$0xff] }
 0x13b   : > { %v770_v55 = vpack.c.bf16 %v740_v53, %v738_v52  ;;  %v778_v57 = vpack.c.bf16 %v756_v56, %v754_v54  ;;  %v1613_v58 = vld [vmem:[%s1932_s3 + $0x10] sm:$0xff]   ;;  %v1614_v59 = vld [vmem:[%s1932_s3 + $0x48] sm:$0xff]   ;;  %v1616_v61 = vld [vmem:[%s1932_s3 + $0x40] sm:$0xff]  }
 0x13c   : > { %1403 = vmatpush3.bf16.msra.mxu0 %v1605_v44  ;;  %1521 = vmatpush3.bf16.msra.mxu1 %v1605_v44  ;;  %v1615_v60 = vld [vmem:[%s1932_s3 + $0x8] sm:$0xff]   ;;  %v1617_v62 = vld [vmem:[%s1932_s3] sm:$0xff]   ;;  %v755_v2 = vld [vmem:[#allocation2 + $0x18] sm:$0xff] }
 0x13d   : > { %1404 = vmatprep.subr.bf16.mxu0 %v1606_v45  ;;  %1514 = vmatprep.subr.bf16.mxu1 %v1606_v45  ;;  %v737_v63 = vld [vmem:[#allocation2 + $0x68] sm:$0xff]  ;;  %v739_v0 = vld [vmem:[#allocation2] sm:$0xff]  ;;  %v744_v4 = vld [vmem:[#allocation2 + $0x98] sm:$0xff] }
 0x13e   : > { %952 = vmatprep.mubr.bf16.mxu0 %v770_v55  ;;  %984 = vmatprep.mubr.bf16.mxu1 %v778_v57  ;;  %v753_v1 = vld [vmem:[#allocation2 + $0x8] sm:$0xff]  ;;  %v742_v3 = vld [vmem:[#allocation2 + $0x80] sm:$0xff]  ;;  %v760_v6 = vld [vmem:[#allocation2 + $0x50] sm:$0xff]  ;;  %v769_v7 = vpack.c.bf16 %v739_v0, %v737_v63 }
 0x13f   : > { %v758_v5 = vld [vmem:[#allocation2 + $0x20] sm:$0xff]  ;;  %v777_v8 = vpack.c.bf16 %v755_v2, %v753_v1  ;;  %v772_v9 = vpack.c.bf16 %v744_v4, %v742_v3  ;;  %v741_v11 = vld [vmem:[#allocation2 + $0xb8] sm:$0xff]  ;;  %v743_v12 = vld [vmem:[#allocation2 + $0x30] sm:$0xff] }
 0x140   : > { %1405 = vmatpush3.bf16.msra.mxu0 %v1607_v46  ;;  %1522 = vmatpush3.bf16.msra.mxu1 %v1607_v46  ;;  %v780_v10 = vpack.c.bf16 %v760_v6, %v758_v5  ;;  %v757_v13 = vld [vmem:[#allocation2 + $0xd8] sm:$0xff]  ;;  %v746_v15 = vld [vmem:[#allocation2 + $0xc8] sm:$0xff]  ;;  %v771_v19 = vpack.c.bf16 %v743_v12, %v741_v11  ;;  %v745_v23 = vld [vmem:[#allocation2 + $0xa0] sm:$0xff] }
 0x141   : > { %1406 = vmatprep.subr.bf16.mxu0 %v1608_v47  ;;  %1515 = vmatprep.subr.bf16.mxu1 %v1608_v47  ;;  %v759_v14 = vld [vmem:[#allocation2 + $0x78] sm:$0xff]  ;;  %v748_v16 = vld [vmem:[#allocation2 + $0x28] sm:$0xff]  ;;  %v747_v24 = vld [vmem:[#allocation2 + $0xd0] sm:$0xff] }
 0x142   : > { %v762_v17 = vld [vmem:[#allocation2 + $0x48] sm:$0xff]  ;;  %v764_v18 = vld [vmem:[#allocation2 + $0xf8] sm:$0xff]  ;;  %v779_v20 = vpack.c.bf16 %v759_v14, %v757_v13  ;;  %v774_v21 = vpack.c.bf16 %v748_v16, %v746_v15  ;;  %v761_v25 = vld [vmem:[#allocation2 + $0xc0] sm:$0xff]  ;;  %v773_v31 = vpack.c.bf16 %v747_v24, %v745_v23 }
 0x143   : > { %v782_v22 = vpack.c.bf16 %v764_v18, %v762_v17  ;;  %v763_v26 = vld [vmem:[#allocation2 + $0xe8] sm:$0xff]  ;;  %v750_v27 = vld [vmem:[#allocation2 + $0xe0] sm:$0xff]  ;;  %v768_v30 = vld [vmem:[#allocation2 + $0x38] sm:$0xff] }
 0x144   : > { %1407 = vmatpush3.bf16.msra.mxu0 %v1609_v48  ;;  %1523 = vmatpush3.bf16.msra.mxu1 %v1609_v48  ;;  %v752_v28 = vld [vmem:[#allocation2 + $0x88] sm:$0xff]  ;;  %v766_v29 = vld [vmem:[#allocation2 + $0x40] sm:$0xff]  ;;  %v781_v32 = vpack.c.bf16 %v763_v26, %v761_v25  ;;  %v751_v36 = vld [vmem:[#allocation2 + $0x90] sm:$0xff] }
 0x145   : > { %1408 = vmatprep.subr.bf16.mxu0 %v1610_v49  ;;  %1516 = vmatprep.subr.bf16.mxu1 %v1610_v49  ;;  %v776_v33 = vpack.c.bf16 %v752_v28, %v750_v27  ;;  %v784_v34 = vpack.c.bf16 %v768_v30, %v766_v29  ;;  %v749_v35 = vld [vmem:[#allocation2 + $0x60] sm:$0xff]  ;;  %v765_v37 = vld [vmem:[#allocation2 + $0x10] sm:$0xff] }
 0x146   : > { %v767_v38 = vld [vmem:[#allocation2 + $0xf0] sm:$0xff]  ;;  %v775_v39 = vpack.c.bf16 %v751_v36, %v749_v35  ;;  %v1882_v45 = vld [vmem:[%s1933_s4] ss:$0 sm:$0xff] }
 0x147   : > { %v783_v40 = vpack.c.bf16 %v767_v38, %v765_v37 }
 0x148   : > { %1409 = vmatpush3.bf16.msra.mxu0 %v1611_v50  ;;  %1524 = vmatpush3.bf16.msra.mxu1 %v1611_v50 }
 0x149   : > { %1410 = vmatprep.subr.bf16.mxu0 %v1612_v51  ;;  %1517 = vmatprep.subr.bf16.mxu1 %v1612_v51 }
 0x14c   : > { %1411 = vmatpush3.bf16.msra.mxu0 %v1613_v58  ;;  %1525 = vmatpush3.bf16.msra.mxu1 %v1613_v58 }
 0x14d   : > { %1412 = vmatprep.subr.bf16.mxu0 %v1614_v59  ;;  %1518 = vmatprep.subr.bf16.mxu1 %v1614_v59 }
 0x150   : > { %1413 = vmatpush3.bf16.msra.mxu0 %v1615_v60  ;;  %1526 = vmatpush3.bf16.msra.mxu1 %v1615_v60 }
 0x151   : > { %1414 = vmatprep.subr.bf16.mxu0 %v1616_v61  ;;  %1519 = vmatprep.subr.bf16.mxu1 %v1616_v61 }
 0x154   : > { %1415 = vmatpush3.bf16.msra.mxu0 %v1617_v62  ;;  %1527 = vmatpush3.bf16.msra.mxu1 %v1617_v62 }
 0x157   : > { %953 = vmatmul.mubr.bf16.vlgmr.msra.gmra.mxu0 %v769_v7  ;;  %985 = vmatmul.mubr.bf16.vlgmr.msra.gmra.mxu1 %v777_v8 }
 0x158   : > { %960 = vmatprep.mubr.bf16.mxu0 %v772_v9  ;;  %992 = vmatprep.mubr.bf16.mxu1 %v780_v10 }
 0x15f   : > { %961 = vmatmul.mubr.bf16.gmra.mxu0 %v771_v19  ;;  %993 = vmatmul.mubr.bf16.gmra.mxu1 %v779_v20 }
 0x160   : > { %968 = vmatprep.mubr.bf16.mxu0 %v774_v21  ;;  %1000 = vmatprep.mubr.bf16.mxu1 %v782_v22 }
 0x167   : > { %969 = vmatmul.mubr.bf16.gmra.mxu0 %v773_v31  ;;  %1001 = vmatmul.mubr.bf16.gmra.mxu1 %v781_v32 }
 0x168   : > { %976 = vmatprep.mubr.bf16.mxu0 %v776_v33  ;;  %1008 = vmatprep.mubr.bf16.mxu1 %v784_v34 }
 0x16f   : > { %977 = vmatmul.mubr.bf16.gmra.mxu0 %v775_v39  ;;  %1009 = vmatmul.mubr.bf16.gmra.mxu1 %v783_v40 }
 0x217   : > { %v1416_v41 = vpop.f32.mrf.mxu0  ;;  %v1440_v42 = vpop.f32.mrf.mxu1 }
 0x219   : > { %v1417_v43 = vpop.f32.mrf.mxu0  ;;  %v1441_v44 = vpop.f32.mrf.mxu1 }
 0x21a   : > { %v1418_v46 = vadd.f32 %v1417_v43, %v1416_v41  ;;  %v1442_v47 = vadd.f32 %v1441_v44, %v1440_v42 }
 0x21b   : > { %v1419_v48 = vpop.f32.mrf.mxu0  ;;  %v1443_v49 = vpop.f32.mrf.mxu1 }
 0x21c   : > { %v955_v50 = vadd.f32 %v1418_v46, %v1882_v45  ;;  %v987_v51 = vadd.f32 %v1442_v47, %v1882_v45 }
 0x21d   : > { %v1420_v52 = vpop.f32.mrf.mxu0  ;;  %v1444_v53 = vpop.f32.mrf.mxu1 }
 0x21e   : > { %v1421_v54 = vadd.f32 %v1420_v52, %v1419_v48  ;;  %v1445_v55 = vadd.f32 %v1444_v53, %v1443_v49  ;;  %v1017_v60 = vmax.f32 %v955_v50, 0.0  ;;  %v1025_v61 = vmax.f32 %v987_v51, 0.0 }
 0x21f   : > { %v1422_v56 = vpop.f32.mrf.mxu0  ;;  %v1446_v57 = vpop.f32.mrf.mxu1 }
 0x220   : > { %v958_v58 = vadd.f32 %v1421_v54, %v1882_v45  ;;  %v990_v59 = vadd.f32 %v1445_v55, %v1882_v45 }
 0x221   : > { %v1423_v62 = vpop.f32.mrf.mxu0  ;;  %v1447_v63 = vpop.f32.mrf.mxu1 }
 0x222   : > { %v1018_v0 = vmax.f32 %v958_v58, 0.0  ;;  %v1026_v1 = vmax.f32 %v990_v59, 0.0  ;;  %v1424_v2 = vadd.f32 %v1423_v62, %v1422_v56  ;;  %v1448_v3 = vadd.f32 %v1447_v63, %v1446_v57 }
 0x223   : > { %v1425_v4 = vpop.f32.mrf.mxu0  ;;  %v1449_v5 = vpop.f32.mrf.mxu1 }
 0x224   : > { %v1333_v6 = vpack.c.bf16 %v1018_v0, %v1017_v60  ;;  %v1353_v7 = vpack.c.bf16 %v1026_v1, %v1025_v61  ;;  %v963_v8 = vadd.f32 %v1424_v2, %v1882_v45  ;;  %v995_v9 = vadd.f32 %v1448_v3, %v1882_v45 }
 0x225   : > { %v1426_v10 = vpop.f32.mrf.mxu0  ;;  %v1450_v11 = vpop.f32.mrf.mxu1 }
 0x226   : > { %1334 = vst [vmem:[%s1801_s14] sm:$0xff] %v1333_v6   ;;  %1380 = vst [vmem:[%s1801_s14 + $0x20] sm:$0xff] %v1353_v7   ;;  %v1427_v12 = vadd.f32 %v1426_v10, %v1425_v4  ;;  %v1451_v13 = vadd.f32 %v1450_v11, %v1449_v5  ;;  %v1019_v18 = vmax.f32 %v963_v8, 0.0  ;;  %v1027_v19 = vmax.f32 %v995_v9, 0.0 }
 0x227   : > { %v1428_v14 = vpop.f32.mrf.mxu0  ;;  %v1452_v15 = vpop.f32.mrf.mxu1 }
 0x228   : > { %v966_v16 = vadd.f32 %v1427_v12, %v1882_v45  ;;  %v998_v17 = vadd.f32 %v1451_v13, %v1882_v45 }
 0x229   : > { %v1429_v20 = vpop.f32.mrf.mxu0  ;;  %v1453_v21 = vpop.f32.mrf.mxu1 }
 0x22a   : > { %v1020_v22 = vmax.f32 %v966_v16, 0.0  ;;  %v1028_v23 = vmax.f32 %v998_v17, 0.0  ;;  %v1430_v24 = vadd.f32 %v1429_v20, %v1428_v14  ;;  %v1454_v25 = vadd.f32 %v1453_v21, %v1452_v15 }
 0x22b   : > { %v1431_v26 = vpop.f32.mrf.mxu0  ;;  %v1455_v27 = vpop.f32.mrf.mxu1 }
 0x22c   : > { %v1338_v28 = vpack.c.bf16 %v1020_v22, %v1019_v18  ;;  %v1358_v29 = vpack.c.bf16 %v1028_v23, %v1027_v19  ;;  %v971_v30 = vadd.f32 %v1430_v24, %v1882_v45  ;;  %v1003_v31 = vadd.f32 %v1454_v25, %v1882_v45 }
 0x22d   : > { %v1432_v32 = vpop.f32.mrf.mxu0  ;;  %v1456_v33 = vpop.f32.mrf.mxu1 }
 0x22e   : > { %1377 = vst [vmem:[%s1801_s14 + $0x8] sm:$0xff] %v1338_v28   ;;  %1381 = vst [vmem:[%s1801_s14 + $0x28] sm:$0xff] %v1358_v29   ;;  %v1433_v34 = vadd.f32 %v1432_v32, %v1431_v26  ;;  %v1457_v35 = vadd.f32 %v1456_v33, %v1455_v27  ;;  %v1021_v40 = vmax.f32 %v971_v30, 0.0  ;;  %v1029_v41 = vmax.f32 %v1003_v31, 0.0 }
 0x22f   : > { %v1434_v36 = vpop.f32.mrf.mxu0  ;;  %v1458_v37 = vpop.f32.mrf.mxu1 }
 0x230   : > { %v974_v38 = vadd.f32 %v1433_v34, %v1882_v45  ;;  %v1006_v39 = vadd.f32 %v1457_v35, %v1882_v45 }
 0x231   : > { %v1435_v42 = vpop.f32.mrf.mxu0  ;;  %v1459_v43 = vpop.f32.mrf.mxu1 }
 0x232   : > { %v1022_v44 = vmax.f32 %v974_v38, 0.0  ;;  %v1030_v46 = vmax.f32 %v1006_v39, 0.0  ;;  %v1436_v47 = vadd.f32 %v1435_v42, %v1434_v36  ;;  %v1460_v48 = vadd.f32 %v1459_v43, %v1458_v37 }
 0x233   : > { %v1437_v49 = vpop.f32.mrf.mxu0  ;;  %v1461_v50 = vpop.f32.mrf.mxu1 }
 0x234   : > { %v1343_v51 = vpack.c.bf16 %v1022_v44, %v1021_v40  ;;  %v1363_v52 = vpack.c.bf16 %v1030_v46, %v1029_v41  ;;  %v979_v55 = vadd.f32 %v1436_v47, %v1882_v45  ;;  %v1011_v56 = vadd.f32 %v1460_v48, %v1882_v45 }
 0x235   : > { %v1438_v53 = vpop.f32.mrf.mxu0  ;;  %v1462_v54 = vpop.f32.mrf.mxu1 }
 0x236   : > { %1378 = vst [vmem:[%s1801_s14 + $0x10] sm:$0xff] %v1343_v51   ;;  %1382 = vst [vmem:[%s1801_s14 + $0x30] sm:$0xff] %v1363_v52   ;;  %v1439_v57 = vadd.f32 %v1438_v53, %v1437_v49  ;;  %v1463_v58 = vadd.f32 %v1462_v54, %v1461_v50  ;;  %v1023_v61 = vmax.f32 %v979_v55, 0.0  ;;  %v1031_v62 = vmax.f32 %v1011_v56, 0.0 }
 0x238   : > { %v982_v59 = vadd.f32 %v1439_v57, %v1882_v45  ;;  %v1014_v60 = vadd.f32 %v1463_v58, %v1882_v45 }
 0x23a   : > { %v1024_v63 = vmax.f32 %v982_v59, 0.0  ;;  %v1032_v0 = vmax.f32 %v1014_v60, 0.0 }
 0x23c   : > { %v1348_v1 = vpack.c.bf16 %v1024_v63, %v1023_v61  ;;  %v1368_v2 = vpack.c.bf16 %v1032_v0, %v1031_v62 }
 0x23e   : > { %1379 = vst [vmem:[%s1801_s14 + $0x18] sm:$0xff] %v1348_v1   ;;  %1383 = vst [vmem:[%s1801_s14 + $0x38] sm:$0xff] %v1368_v2  }
 0x23f PF: > { %s15_s24 = sadd.s32 1, %s1672_s24   ;;  %s1935_s18 = smov %s1652_s19 }
 0x240   : > { %p12_p0 = scmp.ge.s32.totalorder %s15_s24, 11   ;;  %s1936_s19 = smov %s1756_s6 }
 0x241   : > { %s1937_s20 = smov %s1664_s22  ;;  %s1938_s21 = smov %s1668_s23 }
 0x242   : > { %s1939_s22 = smov %s1942_s25  ;;  %s1940_s23 = smov %s1946_s26 }
 0x243   :  { %14 = sbr.rel (!%p12_p0) target bundleno = 4 (0x4), region = 130 }

// kernel: jknet_forward.7
= control target key start
LH: loop header
LB: loop body
LE: loop exit
PB: predicated region body
PF: predicated region fallthrough
CT: control target
= control target key end

     0   :  { %s1692_s24 = smov 0   ;;  %s2064_s0 = inlined_call_operand.vmem [shape: bf16[384,128], index: 0, kind: input, shape index: {}]   ;;  %s2065_s1 = inlined_call_operand.vmem [shape: bf16[384,128], index: 1, kind: input, shape index: {}]   ;;  %s2066_s2 = inlined_call_operand.vmem [shape: bf16[384,128], index: 2, kind: input, shape index: {}]   ;;  %s2067_s3 = inlined_call_operand.vmem [shape: bf16[128,128], index: 3, kind: input, shape index: {}]   ;;  %s2068_s4 = inlined_call_operand.vmem [shape: bf16[128,128], index: 4, kind: input, shape index: {}]   ;;  %s2069_s5 = inlined_call_operand.vmem [shape: bf16[128,128], index: 5, kind: input, shape index: {}]   ;;  %s2070_s6 = inlined_call_operand.vmem [shape: f32[1,128], index: 6, kind: input, shape index: {}]   ;;  %s2071_s7 = inlined_call_operand.vmem [shape: f32[384,128], index: 7, kind: output, shape index: {}]  }
   0x1 LB: > { %s1300_s25 = sadd.s32 4294967295, %s1650_s24   ;;  %p1304_p0 = scmp.ge.s32.totalorder %s1650_s24, 1  ;;  %s1650_s24 = sphi %s1692_s24, %s17_s24  }
   0x2   : > { %p260_p1 = scmp.lt.s32.totalorder %s1650_s24, 4 }
   0x4   : > { %p261_p2 = pnand %p1304_p0, %p260_p1 }
   0x5   : > { %s1305_s28 = sshll.u32 (!%p261_p2), %s1300_s25, 4 }
   0x6   : > { %264 = sbr.rel (%p261_p2) target bundleno = 618 (0x26a), region = 48  ;;  %p303_p3 = scmp.lt.s32.totalorder (!%p261_p2), %s1305_s28, 47 }
   0xb   : > { %v1532_v0 = vld [vmem:[%s2068_s4 + $0x38] sm:$0xff]   ;;  %v1534_v2 = vld [vmem:[%s2068_s4 + $0x30] sm:$0xff]   ;;  %v1536_v4 = vld [vmem:[%s2068_s4 + $0x28] sm:$0xff]   ;;  %s2073_s28 = smov (!%p303_p3, %s1305_s28), 47 }
   0xc   : > { %v1533_v1 = vld [vmem:[%s2067_s3 + $0x38] sm:$0xff]   ;;  %1412 = vmatprep.subr.bf16.mxu0 %v1532_v0  ;;  %v1535_v3 = vld [vmem:[%s2067_s3 + $0x30] sm:$0xff]   ;;  %v1537_v5 = vld [vmem:[%s2067_s3 + $0x28] sm:$0xff]   ;;  %s1727_s20 = sshll.u32 %s2073_s28, 2  ;;  %s1312_s23 = sshll.u32 %s2073_s28, 3 }
   0xd   : > { %1444 = vmatprep.subr.bf16.mxu1 %v1533_v1  ;;  %1413 = vmatpush3.bf16.msra.mxu0 %v1532_v0  ;;  %v1538_v6 = vld [vmem:[%s2068_s4 + $0x20] sm:$0xff]   ;;  %v1540_v8 = vld [vmem:[%s2068_s4 + $0x18] sm:$0xff]   ;;  %s1739_s29 = scalar_lea.vmem %s2065_s1, %s1727_s20  ;;  %v1542_v10 = vld [vmem:[%s2068_s4 + $0x10] sm:$0xff]   ;;  %s1748_s11 = scalar_lea.vmem %s2064_s0, %s1727_s20 }
   0xe   : > { %1445 = vmatpush3.bf16.msra.mxu1 %v1533_v1  ;;  %1414 = vmatprep.subr.bf16.mxu0 %v1534_v2  ;;  %v1539_v7 = vld [vmem:[%s2067_s3 + $0x20] sm:$0xff]   ;;  %v1541_v9 = vld [vmem:[%s2067_s3 + $0x18] sm:$0xff]   ;;  %v1543_v11 = vld [vmem:[%s2067_s3 + $0x10] sm:$0xff]   ;;  %s1786_s12 = scalar_lea.vmem %s2066_s2, %s1727_s20  ;;  %s2027_s27 = scalar_lea.vmem %s2071_s7, %s1312_s23 }
   0xf   : > { %1446 = vmatprep.subr.bf16.mxu1 %v1535_v3  ;;  %v1548_v12 = vld [vmem:[%s1739_s29] sm:$0xff]   ;;  %v1544_v14 = vld [vmem:[%s2068_s4 + $0x8] sm:$0xff]   ;;  %v1552_v18 = vld [vmem:[%s2069_s5 + $0x38] sm:$0xff]  }
  0x10   : > { %v1549_v13 = vld [vmem:[%s1748_s11] sm:$0xff]   ;;  %1428 = vmatprep.mubr.bf16.mxu0 %v1548_v12  ;;  %v1545_v15 = vld [vmem:[%s2067_s3 + $0x8] sm:$0xff]   ;;  %v1553_v21 = vld [vmem:[%s2069_s5 + $0x30] sm:$0xff]  }
  0x11   : > { %1415 = vmatpush3.bf16.msra.mxu0 %v1534_v2  ;;  %1460 = vmatprep.mubr.bf16.mxu1 %v1549_v13  ;;  %v1546_v16 = vld [vmem:[%s2068_s4] sm:$0xff]   ;;  %v1550_v19 = vld [vmem:[%s1739_s29 + $0x8] sm:$0xff]   ;;  %v1554_v22 = vld [vmem:[%s1739_s29 + $0x10] sm:$0xff]  }
  0x12   : > { %1447 = vmatpush3.bf16.msra.mxu1 %v1535_v3  ;;  %1416 = vmatprep.subr.bf16.mxu0 %v1536_v4  ;;  %v1547_v17 = vld [vmem:[%s2067_s3] sm:$0xff]   ;;  %v1551_v20 = vld [vmem:[%s1748_s11 + $0x8] sm:$0xff]   ;;  %v1555_v23 = vld [vmem:[%s1748_s11 + $0x10] sm:$0xff]  }
  0x13   : > { %1448 = vmatprep.subr.bf16.mxu1 %v1537_v5  ;;  %v1558_v24 = vld [vmem:[%s2069_s5 + $0x28] sm:$0xff]   ;;  %v1556_v25 = vld [vmem:[%s1739_s29 + $0x18] sm:$0xff]   ;;  %v1559_v27 = vld [vmem:[%s2069_s5 + $0x20] sm:$0xff]  }
  0x14   : > { %v1557_v26 = vld [vmem:[%s1748_s11 + $0x18] sm:$0xff]   ;;  %v1560_v28 = vld [vmem:[%s1739_s29 + $0x20] sm:$0xff]   ;;  %v1562_v31 = vld [vmem:[%s1739_s29 + $0x28] sm:$0xff]  }
  0x15   : > { %1417 = vmatpush3.bf16.msra.mxu0 %v1536_v4  ;;  %v1561_v29 = vld [vmem:[%s1748_s11 + $0x20] sm:$0xff]   ;;  %v1564_v30 = vld [vmem:[%s2069_s5 + $0x18] sm:$0xff]   ;;  %v1563_v32 = vld [vmem:[%s1748_s11 + $0x28] sm:$0xff]  }
  0x16   : > { %1449 = vmatpush3.bf16.msra.mxu1 %v1537_v5  ;;  %1418 = vmatprep.subr.bf16.mxu0 %v1538_v6  ;;  %v1565_v33 = vld [vmem:[%s2069_s5 + $0x10] sm:$0xff]   ;;  %v1570_v36 = vld [vmem:[%s2069_s5 + $0x8] sm:$0xff]   ;;  %v1568_v37 = vld [vmem:[%s1739_s29 + $0x38] sm:$0xff]  }
  0x17   : > { %1450 = vmatprep.subr.bf16.mxu1 %v1539_v7  ;;  %v1566_v34 = vld [vmem:[%s1739_s29 + $0x30] sm:$0xff]   ;;  %v1569_v38 = vld [vmem:[%s1748_s11 + $0x38] sm:$0xff]   ;;  %v1571_v39 = vld [vmem:[%s2069_s5] sm:$0xff]  }
  0x18   : > { %v1567_v35 = vld [vmem:[%s1748_s11 + $0x30] sm:$0xff]   ;;  %v1572_v40 = vld [vmem:[%s1786_s12] sm:$0xff]   ;;  %v1574_v42 = vld [vmem:[%s1786_s12 + $0x8] sm:$0xff]  }
  0x19   : > { %1419 = vmatpush3.bf16.msra.mxu0 %v1538_v6  ;;  %v1573_v41 = vld [vmem:[%s1786_s12 + $0x20] sm:$0xff]   ;;  %v1575_v43 = vld [vmem:[%s1786_s12 + $0x28] sm:$0xff]   ;;  %v1576_v44 = vld [vmem:[%s1786_s12 + $0x10] sm:$0xff]  }
  0x1a   : > { %1451 = vmatpush3.bf16.msra.mxu1 %v1539_v7  ;;  %1420 = vmatprep.subr.bf16.mxu0 %v1540_v8  ;;  %v1577_v45 = vld [vmem:[%s1786_s12 + $0x30] sm:$0xff]   ;;  %v1578_v46 = vld [vmem:[%s1786_s12 + $0x18] sm:$0xff]  }
  0x1b   : > { %1452 = vmatprep.subr.bf16.mxu1 %v1541_v9  ;;  %v1579_v47 = vld [vmem:[%s1786_s12 + $0x38] sm:$0xff]  }
  0x1d   : > { %1421 = vmatpush3.bf16.msra.mxu0 %v1540_v8 }
  0x1e   : > { %1453 = vmatpush3.bf16.msra.mxu1 %v1541_v9  ;;  %1422 = vmatprep.subr.bf16.mxu0 %v1542_v10 }
  0x1f   : > { %1454 = vmatprep.subr.bf16.mxu1 %v1543_v11 }
  0x21   : > { %1423 = vmatpush3.bf16.msra.mxu0 %v1542_v10 }
  0x22   : > { %1455 = vmatpush3.bf16.msra.mxu1 %v1543_v11  ;;  %1424 = vmatprep.subr.bf16.mxu0 %v1544_v14  ;;  %v1041_v11 = vlaneseq }
  0x23   : > { %1456 = vmatprep.subr.bf16.mxu1 %v1545_v15 }
  0x25   : > { %1425 = vmatpush3.bf16.msra.mxu0 %v1544_v14 }
  0x26   : > { %1457 = vmatpush3.bf16.msra.mxu1 %v1545_v15  ;;  %1426 = vmatprep.subr.bf16.mxu0 %v1546_v16 }
  0x27   : > { %1458 = vmatprep.subr.bf16.mxu1 %v1547_v17 }
  0x29   : > { %1427 = vmatpush3.bf16.msra.mxu0 %v1546_v16  ;;  %v1849_v16 = vand.u32 127, %v1041_v11 }
  0x2a   : > { %1459 = vmatpush3.bf16.msra.mxu1 %v1547_v17  ;;  %1476 = vmatprep.subr.bf16.mxu0 %v1552_v18 }
  0x2b   : > { %1508 = vmatprep.subr.bf16.mxu1 %v1552_v18  ;;  %vm1043_vm0 = vcmp.lt.s32.totalorder %v1849_v16, 8 }
  0x2c   : > { %1429 = vmatmul.mubr.bf16.vlgmr.msra.gmra.mxu0 %v1550_v19 }
  0x2d   : > { %1461 = vmatmul.mubr.bf16.vlgmr.msra.gmra.mxu1 %v1551_v20  ;;  %1477 = vmatpush3.bf16.msra.mxu0 %v1552_v18 }
  0x2e   : > { %1516 = vmatpush3.bf16.msra.mxu1 %v1552_v18  ;;  %1478 = vmatprep.subr.bf16.mxu0 %v1553_v21 }
  0x2f   : > { %1509 = vmatprep.subr.bf16.mxu1 %v1553_v21  ;;  %1432 = vmatprep.mubr.bf16.mxu0 %v1554_v22 }
  0x30   : > { %1464 = vmatprep.mubr.bf16.mxu1 %v1555_v23 }
  0x31   : > { %1479 = vmatpush3.bf16.msra.mxu0 %v1553_v21 }
  0x32   : > { %1517 = vmatpush3.bf16.msra.mxu1 %v1553_v21  ;;  %1480 = vmatprep.subr.bf16.mxu0 %v1558_v24  ;;  %v1856_v21 = vld [vmem:[%s2070_s6] ss:$0 sm:$0xff] }
  0x33   : > { %1510 = vmatprep.subr.bf16.mxu1 %v1558_v24 }
  0x34   : > { %1433 = vmatmul.mubr.bf16.gmra.mxu0 %v1556_v25 }
  0x35   : > { %1465 = vmatmul.mubr.bf16.gmra.mxu1 %v1557_v26  ;;  %1481 = vmatpush3.bf16.msra.mxu0 %v1558_v24 }
  0x36   : > { %1518 = vmatpush3.bf16.msra.mxu1 %v1558_v24  ;;  %1482 = vmatprep.subr.bf16.mxu0 %v1559_v27 }
  0x37   : > { %1511 = vmatprep.subr.bf16.mxu1 %v1559_v27  ;;  %1436 = vmatprep.mubr.bf16.mxu0 %v1560_v28 }
  0x38   : > { %1468 = vmatprep.mubr.bf16.mxu1 %v1561_v29 }
  0x39   : > { %1483 = vmatpush3.bf16.msra.mxu0 %v1559_v27 }
  0x3a   : > { %1519 = vmatpush3.bf16.msra.mxu1 %v1559_v27  ;;  %1484 = vmatprep.subr.bf16.mxu0 %v1564_v30 }
  0x3b   : > { %1512 = vmatprep.subr.bf16.mxu1 %v1564_v30 }
  0x3c   : > { %1437 = vmatmul.mubr.bf16.gmra.mxu0 %v1562_v31 }
  0x3d   : > { %1469 = vmatmul.mubr.bf16.gmra.mxu1 %v1563_v32  ;;  %1485 = vmatpush3.bf16.msra.mxu0 %v1564_v30 }
  0x3e   : > { %1520 = vmatpush3.bf16.msra.mxu1 %v1564_v30  ;;  %1486 = vmatprep.subr.bf16.mxu0 %v1565_v33 }
  0x3f   : > { %1513 = vmatprep.subr.bf16.mxu1 %v1565_v33  ;;  %1440 = vmatprep.mubr.bf16.mxu0 %v1566_v34 }
  0x40   : > { %1472 = vmatprep.mubr.bf16.mxu1 %v1567_v35 }
  0x41   : > { %1487 = vmatpush3.bf16.msra.mxu0 %v1565_v33 }
  0x42   : > { %1521 = vmatpush3.bf16.msra.mxu1 %v1565_v33  ;;  %1488 = vmatprep.subr.bf16.mxu0 %v1570_v36 }
  0x43   : > { %1514 = vmatprep.subr.bf16.mxu1 %v1570_v36 }
  0x44   : > { %1441 = vmatmul.mubr.bf16.gmra.mxu0 %v1568_v37 }
  0x45   : > { %1473 = vmatmul.mubr.bf16.gmra.mxu1 %v1569_v38  ;;  %1489 = vmatpush3.bf16.msra.mxu0 %v1570_v36 }
  0x46   : > { %1522 = vmatpush3.bf16.msra.mxu1 %v1570_v36  ;;  %1490 = vmatprep.subr.bf16.mxu0 %v1571_v39 }
  0x47   : > { %1515 = vmatprep.subr.bf16.mxu1 %v1571_v39  ;;  %1492 = vmatprep.mubr.bf16.mxu0 %v1572_v40 }
  0x48   : > { %1500 = vmatprep.mubr.bf16.mxu1 %v1573_v41 }
  0x49   : > { %1491 = vmatpush3.bf16.msra.mxu0 %v1571_v39 }
  0x4a   : > { %1523 = vmatpush3.bf16.msra.mxu1 %v1571_v39 }
  0x4c   : > { %1493 = vmatmul.mubr.bf16.vlgmr.msra.gmra.mxu0 %v1574_v42 }
  0x4d   : > { %1501 = vmatmul.mubr.bf16.vlgmr.msra.gmra.mxu1 %v1575_v43  ;;  %1496 = vmatprep.mubr.bf16.mxu0 %v1576_v44 }
  0x4e   : > { %1504 = vmatprep.mubr.bf16.mxu1 %v1577_v45 }
  0x54   : > { %1497 = vmatmul.mubr.bf16.gmra.mxu0 %v1578_v46 }
  0x55   : > { %1505 = vmatmul.mubr.bf16.gmra.mxu1 %v1579_v47 }
  0xec   : > { %v1430_v48 = vpop.f32.mrf.mxu0 }
  0xed   : > { %v1462_v49 = vpop.f32.mrf.mxu1 }
  0xee   : > { %v521_v50 = vpop.f32.mrf.mxu0  ;;  %v723_v17 = vadd.f32 %v1462_v49, %v1430_v48 }
  0xef   : > { %v714_v51 = vpop.f32.mrf.mxu1 }
  0xf0   : > { %v1431_v52 = vpop.f32.mrf.mxu0  ;;  %v715_v22 = vadd.f32 %v714_v51, %v521_v50 }
  0xf1   : > { %v1463_v53 = vpop.f32.mrf.mxu1 }
  0xf2   : > { %v524_v54 = vpop.f32.mrf.mxu0  ;;  %v726_v27 = vadd.f32 %v1463_v53, %v1431_v52 }
  0xf3   : > { %v717_v55 = vpop.f32.mrf.mxu1 }
  0xf4   : > { %v1819_v56 = vpop.f32.mrf.mxu0  ;;  %v718_v46 = vadd.f32 %v717_v55, %v524_v54 }
  0xf5   : > { %v1821_v57 = vpop.f32.mrf.mxu1 }
  0xf6   : > { %v1823_v58 = vpop.f32.mrf.mxu0 }
  0xf7   : > { %v1825_v59 = vpop.f32.mrf.mxu1 }
  0xf8   : > { %v1827_v60 = vpop.f32.mrf.mxu0 }
  0xf9   : > { %v1829_v61 = vpop.f32.mrf.mxu1 }
  0xfa   : > { %v1831_v62 = vpop.f32.mrf.mxu0  ;;  %v742_v54 = vadd.f32 %v1829_v61, %v1827_v60 }
  0xfb   : > { %v1833_v63 = vpop.f32.mrf.mxu1 }
  0xfc   : > { %v1438_v0 = vpop.f32.mrf.mxu0 }
  0xfd   : > { %v1470_v1 = vpop.f32.mrf.mxu1 }
  0xfe   : > { %v553_v2 = vpop.f32.mrf.mxu0  ;;  %v755_v19 = vadd.f32 %v1470_v1, %v1438_v0 }
  0xff   : > { %v746_v3 = vpop.f32.mrf.mxu1 }
 0x100   : > { %v1439_v4 = vpop.f32.mrf.mxu0  ;;  %v747_v31 = vadd.f32 %v746_v3, %v553_v2  ;;  %v739_v2 = vadd.f32 %v1821_v57, %v1819_v56  ;;  %v734_v56 = vadd.f32 %v1833_v63, %v1831_v62  ;;  %v731_v57 = vadd.f32 %v1825_v59, %v1823_v58 }
 0x101   : > { %v1471_v5 = vpop.f32.mrf.mxu1 }
 0x102   : > { %v556_v6 = vpop.f32.mrf.mxu0  ;;  %v758_v32 = vadd.f32 %v1471_v5, %v1439_v4 }
 0x103   : > { %v749_v7 = vpop.f32.mrf.mxu1 }
 0x104   : > { %v1835_v8 = vpop.f32.mrf.mxu0  ;;  %v750_v43 = vadd.f32 %v749_v7, %v556_v6 }
 0x105   : > { %v1837_v9 = vpop.f32.mrf.mxu1 }
 0x106   : > { %v1839_v10 = vpop.f32.mrf.mxu0 }
 0x107   : > { %v1841_v12 = vpop.f32.mrf.mxu1 }
 0x108   : > { %v1843_v13 = vpop.f32.mrf.mxu0  ;;  %v763_v58 = vadd.f32 %v1841_v12, %v1839_v10  ;;  %v771_v10 = vadd.f32 %v1837_v9, %v1835_v8 }
 0x109   : > { %v1845_v14 = vpop.f32.mrf.mxu1 }
 0x10a   : > { %v1847_v15 = vpop.f32.mrf.mxu0 }
 0x10b   : > { %v1851_v18 = vpop.f32.mrf.mxu1 }
 0x10c   : > { %v1494_v20 = vpop.f32.mrf.mxu0  ;;  %v766_v63 = vadd.f32 %v1851_v18, %v1847_v15  ;;  %v774_v15 = vadd.f32 %v1845_v14, %v1843_v13 }
 0x10d   : > { %v1004_v23 = vadd.f32 %v1494_v20, %v723_v17  ;;  %v1502_v24 = vpop.f32.mrf.mxu1 }
 0x10e   : > { %v1012_v25 = vadd.f32 %v1502_v24, %v755_v19  ;;  %v939_v26 = vpop.f32.mrf.mxu0 }
 0x10f   : > { %v1002_v28 = vadd.f32 %v939_v26, %v715_v22  ;;  %v971_v29 = vpop.f32.mrf.mxu1  ;;  %v1027_v30 = vadd.f32 %v1856_v21, %v1004_v23 }
 0x110   : > { %v1495_v33 = vpop.f32.mrf.mxu0  ;;  %v1035_v34 = vadd.f32 %v1856_v21, %v1012_v25  ;;  %v1010_v38 = vadd.f32 %v971_v29, %v747_v31 }
 0x111   : > { %v1005_v35 = vadd.f32 %v1495_v33, %v726_v27  ;;  %v1503_v36 = vpop.f32.mrf.mxu1  ;;  %v1863_v37 = vsel %vm1043_vm0, %v1027_v30, -1e+30  ;;  %v1025_v42 = vadd.f32 %v1856_v21, %v1002_v28 }
 0x112   : > { %v1013_v39 = vadd.f32 %v1503_v36, %v758_v32  ;;  %v942_v40 = vpop.f32.mrf.mxu0  ;;  %1064 = vmax.xlane.f32.xlu1 %v1863_v37  ;;  %v1868_v41 = vsel %vm1043_vm0, %v1035_v34, -1e+30  ;;  %v1033_v1 = vadd.f32 %v1856_v21, %v1010_v38 }
 0x113   : > { %1080 = vmax.xlane.f32.xlu0 %v1868_v41  ;;  %v974_v44 = vpop.f32.mrf.mxu1  ;;  %v1028_v45 = vadd.f32 %v1856_v21, %v1005_v35  ;;  %v1003_v52 = vadd.f32 %v942_v40, %v718_v46  ;;  %v1881_v0 = vsel %vm1043_vm0, %v1025_v42, -1e+30 }
 0x114   : > { %v1498_v47 = vpop.f32.mrf.mxu0  ;;  %v1011_v48 = vadd.f32 %v974_v44, %v750_v43  ;;  %v1036_v51 = vadd.f32 %v1856_v21, %v1013_v39  ;;  %v1897_v60 = vsel %vm1043_vm0, %v1033_v1, -1e+30 }
 0x115   : > { %v1506_v49 = vpop.f32.mrf.mxu1  ;;  %v1875_v50 = vsel %vm1043_vm0, %v1028_v45, -1e+30  ;;  %v1008_v7 = vadd.f32 %v1498_v47, %v739_v2  ;;  %v1026_v61 = vadd.f32 %v1856_v21, %v1003_v52 }
 0x116   : > { %v955_v53 = vpop.f32.mrf.mxu0  ;;  %1066 = vmax.xlane.f32.xlu1 %v1875_v50  ;;  %v1891_v5 = vsel %vm1043_vm0, %v1036_v51, -1e+30  ;;  %v1034_v6 = vadd.f32 %v1856_v21, %v1011_v48  ;;  %v1016_v32 = vadd.f32 %v1506_v49, %v771_v10 }
 0x117   : > { %v987_v55 = vpop.f32.mrf.mxu1  ;;  %1060 = vmax.xlane.f32.xlu0 %v1881_v0  ;;  %v1006_v23 = vadd.f32 %v955_v53, %v731_v57  ;;  %v1045_v25 = vsel %vm1043_vm0, %v1026_v61, -1e+30  ;;  %v1031_v62 = vadd.f32 %v1856_v21, %v1008_v7 }
 0x118   : > { %v1499_v3 = vpop.f32.mrf.mxu0  ;;  %v1907_v20 = vsel %vm1043_vm0, %v1034_v6, -1e+30  ;;  %v1014_v28 = vadd.f32 %v987_v55, %v763_v58  ;;  %v1039_v14 = vadd.f32 %v1856_v21, %v1016_v32 }
 0x119   : > { %v1009_v4 = vadd.f32 %v1499_v3, %v742_v54  ;;  %v1507_v11 = vpop.f32.mrf.mxu1  ;;  %v1050_v29 = vsel %vm1043_vm0, %v1031_v62, -1e+30  ;;  %v1029_v30 = vadd.f32 %v1856_v21, %v1006_v23 }
 0x11a   : > { %v958_v17 = vpop.f32.mrf.mxu0  ;;  %1082 = vmax.xlane.f32.xlu1 %v1891_v5  ;;  %v1017_v12 = vadd.f32 %v1507_v11, %v774_v15  ;;  %v1037_v34 = vadd.f32 %v1856_v21, %v1014_v28  ;;  %v1959_v36 = vsel %vm1043_vm0, %v1039_v14, -1e+30 }
 0x11b   : > { %1076 = vmax.xlane.f32.xlu0 %v1897_v60  ;;  %v1007_v19 = vadd.f32 %v958_v17, %v734_v56  ;;  %v1032_v22 = vadd.f32 %v1856_v21, %v1009_v4  ;;  %v990_v24 = vpop.f32.mrf.mxu1  ;;  %v1048_v33 = vsel %vm1043_vm0, %v1029_v30, -1e+30 }
 0x11c   : > { %v1015_v59 = vadd.f32 %v990_v24, %v766_v63  ;;  %v1040_v8 = vadd.f32 %v1856_v21, %v1017_v12  ;;  %v1948_v9 = vsel %vm1043_vm0, %v1037_v34, -1e+30 }
 0x11d   : > { %v1920_v26 = vsel %vm1043_vm0, %v1032_v22, -1e+30  ;;  %v1030_v27 = vadd.f32 %v1856_v21, %v1007_v19 }
 0x11e   : > { %1078 = vmax.xlane.f32.xlu1 %v1907_v20  ;;  %v1038_v31 = vadd.f32 %v1856_v21, %v1015_v59  ;;  %v1954_v35 = vsel %vm1043_vm0, %v1040_v8, -1e+30 }
 0x11f   : > { %1062 = vmax.xlane.f32.xlu0 %v1045_v25  ;;  %v1933_v18 = vsel %vm1043_vm0, %v1030_v27, -1e+30 }
 0x120   : > { %v1942_v13 = vsel %vm1043_vm0, %v1038_v31, -1e+30 }
 0x122   : > { %1074 = vmax.xlane.f32.xlu1 %v1920_v26 }
 0x123   : > { %1072 = vmax.xlane.f32.xlu0 %v1050_v29 }
 0x126   : > { %1070 = vmax.xlane.f32.xlu1 %v1933_v18 }
 0x127   : > { %1068 = vmax.xlane.f32.xlu0 %v1048_v33 }
 0x12a   : > { %1086 = vmax.xlane.f32.xlu1 %v1942_v13 }
 0x12b   : > { %1084 = vmax.xlane.f32.xlu0 %v1948_v9 }
 0x12e   : > { %1090 = vmax.xlane.f32.xlu1 %v1954_v35 }
 0x12f   : > { %1088 = vmax.xlane.f32.xlu0 %v1959_v36 }
 0x19b   : > { %v1065_v38 = vpop.xlane.xlu1 %1064 }
 0x19c   : > { %v1094_v39 = vsub.f32 %v1863_v37, %v1065_v38  ;;  %v1081_v40 = vpop.xlane.xlu0 %1080 }
 0x19d   : > { %v1102_v21 = vsub.f32 %v1868_v41, %v1081_v40 }
 0x19e   : > { %v1112_v42 = vmul.f32 1.442695, %v1094_v39 }
 0x19f   : > { %v1128_v43 = vmul.f32 1.442695, %v1102_v21  ;;  %v1067_v44 = vpop.xlane.xlu1 %1066 }
 0x1a0   : > { %1580 = vpow2.f32 %v1112_v42  ;;  %v1095_v45 = vsub.f32 %v1875_v50, %v1067_v44  ;;  %v1061_v46 = vpop.xlane.xlu0 %1060 }
 0x1a1   : > { %v1092_v47 = vsub.f32 %v1881_v0, %v1061_v46  ;;  %1582 = vpow2.f32 %v1128_v43 }
 0x1a2   : > { %v1114_v16 = vmul.f32 1.442695, %v1095_v45 }
 0x1a3   : > { %v1108_v48 = vmul.f32 1.442695, %v1092_v47  ;;  %v1083_v49 = vpop.xlane.xlu1 %1082 }
 0x1a4   : > { %1584 = vpow2.f32 %v1114_v16  ;;  %v1103_v51 = vsub.f32 %v1891_v5, %v1083_v49  ;;  %v1077_v37 = vpop.xlane.xlu0 %1076 }
 0x1a5   : > { %v1100_v52 = vsub.f32 %v1897_v60, %v1077_v37  ;;  %1586 = vpow2.f32 %v1108_v48 }
 0x1a6   : > { %v1130_v41 = vmul.f32 1.442695, %v1103_v51 }
 0x1a7   : > { %v1079_v53 = vpop.xlane.xlu1 %1078  ;;  %v1124_v1 = vmul.f32 1.442695, %v1100_v52 }
 0x1a8   : > { %1588 = vpow2.f32 %v1130_v41  ;;  %v1101_v50 = vsub.f32 %v1907_v20, %v1079_v53  ;;  %v1063_v54 = vpop.xlane.xlu0 %1062 }
 0x1a9   : > { %v1093_v55 = vsub.f32 %v1045_v25, %v1063_v54  ;;  %1590 = vpow2.f32 %v1124_v1 }
 0x1aa   : > { %v1126_v3 = vmul.f32 1.442695, %v1101_v50 }
 0x1ab   : > { %v1110_v0 = vmul.f32 1.442695, %v1093_v55  ;;  %v1075_v2 = vpop.xlane.xlu1 %1074 }
 0x1ac   : > { %v1099_v4 = vsub.f32 %v1920_v26, %v1075_v2  ;;  %v1073_v6 = vpop.xlane.xlu0 %1072 }
 0x1ad   : > { %v1970_v5 = vpop.eup %1580  ;;  %1592 = vpow2.f32 %v1110_v0  ;;  %v1098_v7 = vsub.f32 %v1050_v29, %v1073_v6 }
 0x1ae   : > { %1144 = vadd.xlane.f32.xlu0 %v1970_v5  ;;  %v1973_v60 = vpop.eup %1582  ;;  %1594 = vpow2.f32 %v1126_v3  ;;  %v1122_v61 = vmul.f32 1.442695, %v1099_v4 }
 0x1af   : > { %v1120_v11 = vmul.f32 1.442695, %v1098_v7  ;;  %v1071_v17 = vpop.xlane.xlu1 %1070 }
 0x1b0   : > { %v1097_v56 = vsub.f32 %v1933_v18, %v1071_v17  ;;  %v1069_v57 = vpop.xlane.xlu0 %1068 }
 0x1b1   : > { %v1976_v19 = vpop.eup %1584  ;;  %1596 = vpow2.f32 %v1120_v11  ;;  %v1096_v20 = vsub.f32 %v1048_v33, %v1069_v57 }
 0x1b2   : > { %1146 = vadd.xlane.f32.xlu1 %v1976_v19  ;;  %1160 = vadd.xlane.f32.xlu0 %v1973_v60  ;;  %v1980_v24 = vpop.eup %1586  ;;  %1598 = vpow2.f32 %v1122_v61  ;;  %v1118_v25 = vmul.f32 1.442695, %v1097_v56 }
 0x1b3   : > { %v1116_v22 = vmul.f32 1.442695, %v1096_v20  ;;  %v1087_v23 = vpop.xlane.xlu1 %1086 }
 0x1b4   : > { %v1105_v62 = vsub.f32 %v1942_v13, %v1087_v23  ;;  %v1085_v63 = vpop.xlane.xlu0 %1084 }
 0x1b5   : > { %v1983_v58 = vpop.eup %1588  ;;  %1600 = vpow2.f32 %v1116_v22  ;;  %v1104_v59 = vsub.f32 %v1948_v9, %v1085_v63 }
 0x1b6   : > { %1162 = vadd.xlane.f32.xlu1 %v1983_v58  ;;  %1140 = vadd.xlane.f32.xlu0 %v1980_v24  ;;  %1602 = vpow2.f32 %v1118_v25  ;;  %v1134_v28 = vmul.f32 1.442695, %v1105_v62  ;;  %v1988_v30 = vpop.eup %1590 }
 0x1b7   : > { %v1132_v26 = vmul.f32 1.442695, %v1104_v59  ;;  %v1091_v27 = vpop.xlane.xlu1 %1090 }
 0x1b8   : > { %v1089_v29 = vpop.xlane.xlu0 %1088  ;;  %v1107_v15 = vsub.f32 %v1954_v35, %v1091_v27 }
 0x1b9   : > { %1604 = vpow2.f32 %v1132_v26  ;;  %v1106_v10 = vsub.f32 %v1959_v36, %v1089_v29 }
 0x1ba   : > { %v1992_v12 = vpop.eup %1592  ;;  %1156 = vadd.xlane.f32.xlu0 %v1988_v30  ;;  %1606 = vpow2.f32 %v1134_v28  ;;  %v1138_v32 = vmul.f32 1.442695, %v1107_v15 }
 0x1bb   : > { %v1136_v18 = vmul.f32 1.442695, %v1106_v10  ;;  %1142 = vadd.xlane.f32.xlu1 %v1992_v12  ;;  %v1996_v31 = vpop.eup %1594 }
 0x1bd   : > { %1608 = vpow2.f32 %v1136_v18 }
 0x1be   : > { %v1998_v33 = vpop.eup %1596  ;;  %1610 = vpow2.f32 %v1138_v32 }
 0x1bf   : > { %1158 = vadd.xlane.f32.xlu1 %v1996_v31  ;;  %1152 = vadd.xlane.f32.xlu0 %v1998_v33  ;;  %v2002_v34 = vpop.eup %1598 }
 0x1c2   : > { %v2004_v13 = vpop.eup %1600 }
 0x1c3   : > { %1154 = vadd.xlane.f32.xlu1 %v2002_v34  ;;  %1148 = vadd.xlane.f32.xlu0 %v2004_v13  ;;  %v2008_v8 = vpop.eup %1602 }
 0x1c6   : > { %v2010_v9 = vpop.eup %1604 }
 0x1c7   : > { %1150 = vadd.xlane.f32.xlu1 %v2008_v8  ;;  %1164 = vadd.xlane.f32.xlu0 %v2010_v9  ;;  %v2014_v14 = vpop.eup %1606 }
 0x1ca   : > { %v2016_v35 = vpop.eup %1608 }
 0x1cb   : > { %1166 = vadd.xlane.f32.xlu1 %v2014_v14  ;;  %1168 = vadd.xlane.f32.xlu0 %v2016_v35  ;;  %v2020_v36 = vpop.eup %1610 }
 0x1cf   : > { %1170 = vadd.xlane.f32.xlu1 %v2020_v36 }
 0x237   : > { %v1145_v38 = vpop.xlane.xlu0 %1144 }
 0x238   : > { %1612 = vrcp.f32 %v1145_v38 }
 0x23b   : > { %v1147_v39 = vpop.xlane.xlu1 %1146  ;;  %v1161_v40 = vpop.xlane.xlu0 %1160 }
 0x23c   : > { %1614 = vrcp.f32 %v1147_v39 }
 0x23d   : > { %1616 = vrcp.f32 %v1161_v40 }
 0x23f   : > { %v1163_v21 = vpop.xlane.xlu1 %1162  ;;  %v1141_v42 = vpop.xlane.xlu0 %1140 }
 0x240   : > { %1618 = vrcp.f32 %v1163_v21 }
 0x241   : > { %1620 = vrcp.f32 %v1141_v42 }
 0x243   : > { %v1157_v43 = vpop.xlane.xlu0 %1156 }
 0x244   : > { %v1143_v44 = vpop.xlane.xlu1 %1142  ;;  %1622 = vrcp.f32 %v1157_v43 }
 0x245   : > { %v1613_v45 = vpop.eup %1612  ;;  %1624 = vrcp.f32 %v1143_v44 }
 0x246   : > { %v1190_v46 = vmul.f32 %v1613_v45, %v1970_v5 }
 0x248   : > { %1206 = vst [vmem:[%s2027_s27 + $0x10] sm:$0xff] %v1190_v46  ;;  %v1159_v47 = vpop.xlane.xlu1 %1158  ;;  %v1153_v16 = vpop.xlane.xlu0 %1152 }
 0x249   : > { %v1615_v48 = vpop.eup %1614  ;;  %1626 = vrcp.f32 %v1159_v47 }
 0x24a   : > { %v1617_v49 = vpop.eup %1616  ;;  %v1191_v51 = vmul.f32 %v1615_v48, %v1976_v19  ;;  %1628 = vrcp.f32 %v1153_v16 }
 0x24b   : > { %v1198_v37 = vmul.f32 %v1617_v49, %v1973_v60 }
 0x24c   : > { %1207 = vst [vmem:[%s2027_s27 + $0x18] sm:$0xff] %v1191_v51  ;;  %v1155_v52 = vpop.xlane.xlu1 %1154  ;;  %v1149_v41 = vpop.xlane.xlu0 %1148 }
 0x24d   : > { %v1619_v53 = vpop.eup %1618  ;;  %1214 = vst [vmem:[%s2027_s27 + $0x50] sm:$0xff] %v1198_v37  ;;  %1630 = vrcp.f32 %v1155_v52 }
 0x24e   : > { %v1621_v1 = vpop.eup %1620  ;;  %v1199_v50 = vmul.f32 %v1619_v53, %v1983_v58  ;;  %1632 = vrcp.f32 %v1149_v41 }
 0x24f   : > { %v1188_v54 = vmul.f32 %v1621_v1, %v1980_v24 }
 0x250   : > { %1215 = vst [vmem:[%s2027_s27 + $0x58] sm:$0xff] %v1199_v50  ;;  %v1151_v55 = vpop.xlane.xlu1 %1150  ;;  %v1165_v0 = vpop.xlane.xlu0 %1164 }
 0x251   : > { %v1623_v2 = vpop.eup %1622  ;;  %1204 = vst [vmem:[%s2027_s27] sm:$0xff] %v1188_v54  ;;  %1634 = vrcp.f32 %v1151_v55 }
 0x252   : > { %v1625_v3 = vpop.eup %1624  ;;  %v1196_v4 = vmul.f32 %v1623_v2, %v1988_v30  ;;  %1636 = vrcp.f32 %v1165_v0 }
 0x253   : > { %v1189_v6 = vmul.f32 %v1625_v3, %v1992_v12 }
 0x254   : > { %1212 = vst [vmem:[%s2027_s27 + $0x40] sm:$0xff] %v1196_v4  ;;  %v1167_v5 = vpop.xlane.xlu1 %1166  ;;  %v1169_v7 = vpop.xlane.xlu0 %1168 }
 0x255   : > { %1205 = vst [vmem:[%s2027_s27 + $0x8] sm:$0xff] %v1189_v6  ;;  %1638 = vrcp.f32 %v1167_v5 }
 0x256   : > { %v1627_v11 = vpop.eup %1626  ;;  %1640 = vrcp.f32 %v1169_v7 }
 0x257   : > { %v1629_v17 = vpop.eup %1628  ;;  %v1197_v60 = vmul.f32 %v1627_v11, %v1996_v31 }
 0x258   : > { %v1194_v61 = vmul.f32 %v1629_v17, %v1998_v33  ;;  %v1171_v56 = vpop.xlane.xlu1 %1170 }
 0x259   : > { %1213 = vst [vmem:[%s2027_s27 + $0x48] sm:$0xff] %v1197_v60  ;;  %1642 = vrcp.f32 %v1171_v56 }
 0x25a   : > { %v1631_v57 = vpop.eup %1630  ;;  %1210 = vst [vmem:[%s2027_s27 + $0x30] sm:$0xff] %v1194_v61 }
 0x25b   : > { %v1633_v19 = vpop.eup %1632  ;;  %v1195_v20 = vmul.f32 %v1631_v57, %v2002_v34 }
 0x25c   : > { %v1192_v22 = vmul.f32 %v1633_v19, %v2004_v13 }
 0x25d   : > { %1211 = vst [vmem:[%s2027_s27 + $0x38] sm:$0xff] %v1195_v20 }
 0x25e   : > { %v1635_v23 = vpop.eup %1634  ;;  %1208 = vst [vmem:[%s2027_s27 + $0x20] sm:$0xff] %v1192_v22 }
 0x25f   : > { %v1637_v24 = vpop.eup %1636  ;;  %v1193_v25 = vmul.f32 %v1635_v23, %v2008_v8 }
 0x260   : > { %v1200_v62 = vmul.f32 %v1637_v24, %v2010_v9 }
 0x261   : > { %1209 = vst [vmem:[%s2027_s27 + $0x28] sm:$0xff] %v1193_v25 }
 0x262   : > { %v1639_v63 = vpop.eup %1638  ;;  %1216 = vst [vmem:[%s2027_s27 + $0x60] sm:$0xff] %v1200_v62 }
 0x263   : > { %v1641_v58 = vpop.eup %1640  ;;  %v1201_v59 = vmul.f32 %v1639_v63, %v2014_v14 }
 0x264   : > { %v1202_v26 = vmul.f32 %v1641_v58, %v2016_v35 }
 0x265   : > { %1217 = vst [vmem:[%s2027_s27 + $0x68] sm:$0xff] %v1201_v59 }
 0x266   : > { %v1643_v27 = vpop.eup %1642  ;;  %1218 = vst [vmem:[%s2027_s27 + $0x70] sm:$0xff] %v1202_v26 }
 0x267   : > { %v1203_v28 = vmul.f32 %v1643_v27, %v2020_v36 }
 0x269   : > { %1219 = vst [vmem:[%s2027_s27 + $0x78] sm:$0xff] %v1203_v28 }
 0x26a PF: > { %s17_s24 = sadd.s32 1, %s1650_s24  }
 0x26b   : > { %p14_p4 = scmp.ge.s32.totalorder %s17_s24, 5  }
 0x26d   :  { %16 = sbr.rel (!%p14_p4) target bundleno = 1 (0x1), region = 84 }

</bundles_post_ra>
